<compile_context>
chip_gen: v7x
topology: tpu7x:2x2x1
jax: 0.10.0
libtpu: 0.0.40
codegen_flags: <defaults>
</compile_context>

<pallas_src>
import math
import jax
import jax.numpy as jnp
from jax.experimental import pallas as pl
from jax.experimental.pallas import tpu as pltpu

# ---- scaled-down hyperparameters (stand-ins for the real model sizes) -------
NUM_CLASSES = 8      # num_classes (80 in real ML-GCN / COCO)
IN_CHANNEL  = 32     # word-embedding dim (300 in the real model)
OUT_CHANNEL = 64     # out_channel (2048 in the real model)
HID         = OUT_CHANNEL // 2
BACKBONE_C  = 32     # backbone feature channels (2048 in the real model)
IMG_C       = 4
IMG_HW      = 14     # resnet101 on 448x448 -> 14x14 map; MaxPool2d(14,14) -> 1x1
BATCH       = 2
BN_EPS      = 1e-5

C_PAD = 128          # class axis padded to a full lane width (lane-dense output)
TN    = 8            # batch-tile rows per grid step (sublane-aligned)


# ----------------------------- fused forward kernel --------------------------
def _make_fused_kernel(tn, hw, hw_pad, backbone_c):
    def kernel(x_ref, wb_ref, wt_ref, bt_ref, adj_ref, inp_ref, w1_ref, w2_ref,
               o_ref):
        # ---- backbone stand-in: one 1x1-conv matmul for the whole batch tile.
        # TODO(synk): the pretrained resnet101 backbone has no self-contained
        # Pallas equivalent; a deterministic 1x1-conv projection stands in.
        # x_ref is (IMG_C, TN*HW_PAD) bf16: N*HW on lanes -> lane-dense DMA.
        y = jax.lax.dot_general(
            x_ref[...], wb_ref[...], (((0,), (0,)), ((), ())),
            preferred_element_type=jnp.float32)            # (TN*HW_PAD, Cb) f32

        # ---- MaxPool2d(14,14) over a 14x14 map == global spatial max per image
        # mask the padded spatial rows to -inf so they never win the max.
        y = y.reshape(tn, hw_pad, backbone_c)
        hw_idx = jax.lax.broadcasted_iota(jnp.int32, y.shape, 1)
        pooled = jnp.max(jnp.where(hw_idx < hw, y, -jnp.inf), axis=1)  # (TN, Cb)

        # ---- transition 1x1 conv; eval-mode BatchNorm folded into w + b ------
        # TODO(synk): BatchNorm2d is modeled in eval mode (running stats only).
        feature = (jnp.dot(pooled.astype(jnp.bfloat16), wt_ref[...],
                           preferred_element_type=jnp.float32)
                   + bt_ref[...])                           # (TN, OUT) f32

        # ---- GCN classifier branch on the PRE-NORMALIZED adjacency -----------
        # (gen_adj hoisted to the wrapper).  Batch-independent; recomputed per
        # grid step — negligible FLOPs and safe under megacore grid splitting.
        adj = adj_ref[...]                                  # (C_PAD, C_PAD) bf16
        g = jnp.dot(inp_ref[...], w1_ref[...],
                    preferred_element_type=jnp.float32)     # (C_PAD, HID)
        g = jnp.dot(adj, g.astype(jnp.bfloat16),
                    preferred_element_type=jnp.float32)
        g = jnp.where(g >= 0.0, g, 0.2 * g)                 # LeakyReLU(0.2), f32
        g = jnp.dot(g.astype(jnp.bfloat16), w2_ref[...],
                    preferred_element_type=jnp.float32)     # (C_PAD, OUT)
        g = jnp.dot(adj, g.astype(jnp.bfloat16),
                    preferred_element_type=jnp.float32)

        # ---- out = feature @ g.T : lane-dense (TN, C_PAD) store (unmasked vst)
        o_ref[...] = jax.lax.dot_general(
            feature.astype(jnp.bfloat16), g.astype(jnp.bfloat16),
            (((1,), (1,)), ((), ())),
            preferred_element_type=jnp.float32)
    return kernel


def _pad_tile_bytes(rows, cols, itemsize):
    """Approximate padded DMA bytes of a 2-D operand ((8,128) tiling)."""
    return ((rows + 7) // 8) * 8 * ((cols + 127) // 128) * 128 * itemsize


# -------------------------------- full forward -------------------------------
def gcn_resnet_forward(x_nchw, params, tn=TN):
    n, c, h, w = x_nchw.shape
    hw = h * w
    hw_pad = ((hw + 127) // 128) * 128          # lane-aligned spatial padding
    n_pad = ((max(n, tn) + tn - 1) // tn) * tn  # batch padded to a tile multiple
    grid = n_pad // tn
    bc = params["w_backbone"].shape[1]

    # --- image layout: NCHW -> (C, N_PAD*HW_PAD) bf16, N*HW on the lane axis --
    x3 = x_nchw.reshape(n, c, hw)
    x3 = jnp.pad(x3, ((0, n_pad - n), (0, 0), (0, hw_pad - hw)))
    x2 = jnp.transpose(x3, (1, 0, 2)).reshape(c, n_pad * hw_pad)
    x2 = x2.astype(jnp.bfloat16)

    # --- fold eval-mode BatchNorm2d into the transition conv weight / bias ----
    scale = params["bn_gamma"] * jax.lax.rsqrt(params["bn_var"] + BN_EPS)
    w_trans = (params["w_trans"] * scale).astype(jnp.bfloat16)          # (Cb,OUT)
    b_trans = (params["bn_beta"] - params["bn_mean"] * scale)           # (1, OUT) f32

    # --- gen_adj hoisted to the wrapper (constant data; rsqrt with zero guard) -
    c_cls = params["A"].shape[0]
    a_pad = jnp.zeros((C_PAD, C_PAD), jnp.float32).at[:c_cls, :c_cls].set(params["A"])
    rs = jnp.sum(a_pad, axis=1, keepdims=True)
    d = jax.lax.rsqrt(jnp.where(rs > 0.0, rs, 1.0))
    adj_norm = ((a_pad * d).T * d).astype(jnp.bfloat16)   # adj[i,j]=A[j,i]*d[i]*d[j]

    inp_pad = jnp.zeros((C_PAD, params["inp"].shape[1]), jnp.float32)
    inp_pad = inp_pad.at[:c_cls, :].set(params["inp"]).astype(jnp.bfloat16)

    w_backbone = params["w_backbone"].astype(jnp.bfloat16)
    w_gc1 = params["w_gc1"].astype(jnp.bfloat16)
    w_gc2 = params["w_gc2"].astype(jnp.bfloat16)

    # --- cost estimate with padded / DMA'd byte counts ------------------------
    flops = 2 * (n_pad * hw_pad * c * bc
                 + n_pad * bc * OUT_CHANNEL
                 + n_pad * OUT_CHANNEL * C_PAD)
    flops += 2 * grid * (C_PAD * IN_CHANNEL * HID + C_PAD * C_PAD * HID
                         + C_PAD * HID * OUT_CHANNEL + C_PAD * C_PAD * OUT_CHANNEL)
    bytes_accessed = (
        _pad_tile_bytes(c, n_pad * hw_pad, 2)
        + _pad_tile_bytes(c, bc, 2)
        + _pad_tile_bytes(bc, OUT_CHANNEL, 2)
        + _pad_tile_bytes(1, OUT_CHANNEL, 4)
        + _pad_tile_bytes(C_PAD, C_PAD, 2)
        + _pad_tile_bytes(C_PAD, IN_CHANNEL, 2)
        + _pad_tile_bytes(IN_CHANNEL, HID, 2)
        + _pad_tile_bytes(HID, OUT_CHANNEL, 2)
        + _pad_tile_bytes(n_pad, C_PAD, 4))

    out_pad = pl.pallas_call(
        _make_fused_kernel(tn, hw, hw_pad, bc),
        out_shape=jax.ShapeDtypeStruct((n_pad, C_PAD), jnp.float32),
        grid=(grid,),
        in_specs=[
            # batch-tiled image tensor: (IMG_C, TN*HW_PAD) per step
            pl.BlockSpec((c, tn * hw_pad), lambda i: (0, i)),
            # weights / constants: constant index_map -> fetched once, resident
            pl.BlockSpec((c, bc), lambda i: (0, 0)),
            pl.BlockSpec((bc, OUT_CHANNEL), lambda i: (0, 0)),
            pl.BlockSpec((1, OUT_CHANNEL), lambda i: (0, 0)),
            pl.BlockSpec((C_PAD, C_PAD), lambda i: (0, 0)),
            pl.BlockSpec((C_PAD, IN_CHANNEL), lambda i: (0, 0)),
            pl.BlockSpec((IN_CHANNEL, HID), lambda i: (0, 0)),
            pl.BlockSpec((HID, OUT_CHANNEL), lambda i: (0, 0)),
        ],
        out_specs=pl.BlockSpec((tn, C_PAD), lambda i: (i, 0)),
        compiler_params=pltpu.CompilerParams(
            dimension_semantics=("parallel",),
            vmem_limit_bytes=32 * 1024 * 1024),
        cost_estimate=pl.CostEstimate(flops=int(flops),
                                      transcendentals=0,
                                      bytes_accessed=int(bytes_accessed)),
    )(x2, w_backbone, w_trans, b_trans, adj_norm, inp_pad, w_gc1, w_gc2)

    # slice padded batch rows and padded class columns back off (outside kernel)
    return out_pad[:n, :c_cls]


if __name__ == "__main__":
    key = jax.random.PRNGKey(0)
    ks = jax.random.split(key, 8)

    # deterministic example input (NCHW, as in PyTorch)
    x_nchw = jax.random.normal(ks[0], (BATCH, IMG_C, IMG_HW, IMG_HW), jnp.float32)

    # deterministic synthetic parameters
    params = {
        "w_backbone": jax.random.normal(ks[1], (IMG_C, BACKBONE_C), jnp.float32) * 0.1,
        "w_trans":    jax.random.normal(ks[2], (BACKBONE_C, OUT_CHANNEL), jnp.float32) * 0.1,
        "bn_gamma":   jnp.ones((1, OUT_CHANNEL), jnp.float32),
        "bn_beta":    jnp.zeros((1, OUT_CHANNEL), jnp.float32),
        "bn_mean":    jnp.zeros((1, OUT_CHANNEL), jnp.float32),
        "bn_var":     jnp.ones((1, OUT_CHANNEL), jnp.float32),
    }

    # GraphConvolution init: uniform(-stdv, stdv), stdv = 1 / sqrt(out_features)
    stdv1 = 1.0 / math.sqrt(HID)
    params["w_gc1"] = jax.random.uniform(ks[3], (IN_CHANNEL, HID), jnp.float32,
                                         minval=-stdv1, maxval=stdv1)
    stdv2 = 1.0 / math.sqrt(OUT_CHANNEL)
    params["w_gc2"] = jax.random.uniform(ks[4], (HID, OUT_CHANNEL), jnp.float32,
                                         minval=-stdv2, maxval=stdv2)

    # label co-occurrence adjacency A (strictly positive rows so D^-1/2 is finite)
    params["A"] = jax.random.uniform(ks[5], (NUM_CLASSES, NUM_CLASSES), jnp.float32,
                                     minval=0.1, maxval=1.0)
    # word embeddings `inp` (replaces the pickled glove vectors)
    params["inp"] = jax.random.normal(ks[6], (NUM_CLASSES, IN_CHANNEL), jnp.float32)

    out = gcn_resnet_forward(x_nchw, params)
    jax.block_until_ready(out)
    assert out.shape == (BATCH, NUM_CLASSES) and out.dtype == jnp.float32
    assert bool(jnp.all(jnp.isfinite(out)))
    print("KERNEL_OK")
</pallas_src>

<mosaic_0001>
module attributes {stable_mosaic.version = 11 : i64} {
  func.func @kernel(%arg0: i32, %arg1: memref<4x2048xbf16, #tpu.memory_space<vmem>>, %arg2: memref<4x32xbf16, #tpu.memory_space<vmem>>, %arg3: memref<32x64xbf16, #tpu.memory_space<vmem>>, %arg4: memref<1x64xf32, #tpu.memory_space<vmem>>, %arg5: memref<128x128xbf16, #tpu.memory_space<vmem>>, %arg6: memref<128x32xbf16, #tpu.memory_space<vmem>>, %arg7: memref<32x32xbf16, #tpu.memory_space<vmem>>, %arg8: memref<32x64xbf16, #tpu.memory_space<vmem>>, %arg9: memref<8x128xf32, #tpu.memory_space<vmem>>) attributes {dimension_semantics = [#tpu.dimension_semantics<parallel>], iteration_bounds = array<i64: 1>, scalar_prefetch = 0 : i64, scratch_operands = 0 : i64, tpu.core_type = #tpu.core_type<tc>, window_params = [{transform_indices = @transform_0, window_bounds = array<i64: 4, 2048>}, {pipeline_mode = #tpu.pipeline_mode<synchronous>, transform_indices = @transform_1, window_bounds = array<i64: 4, 32>}, {pipeline_mode = #tpu.pipeline_mode<synchronous>, transform_indices = @transform_2, window_bounds = array<i64: 32, 64>}, {pipeline_mode = #tpu.pipeline_mode<synchronous>, transform_indices = @transform_3, window_bounds = array<i64: 1, 64>}, {pipeline_mode = #tpu.pipeline_mode<synchronous>, transform_indices = @transform_4, window_bounds = array<i64: 128, 128>}, {pipeline_mode = #tpu.pipeline_mode<synchronous>, transform_indices = @transform_5, window_bounds = array<i64: 128, 32>}, {pipeline_mode = #tpu.pipeline_mode<synchronous>, transform_indices = @transform_6, window_bounds = array<i64: 32, 32>}, {pipeline_mode = #tpu.pipeline_mode<synchronous>, transform_indices = @transform_7, window_bounds = array<i64: 32, 64>}, {transform_indices = @transform_8, window_bounds = array<i64: 8, 128>}]} {
    %c0 = arith.constant 0 : index
    %c0_0 = arith.constant 0 : index
    %0 = vector.load %arg1[%c0, %c0_0] : memref<4x2048xbf16, #tpu.memory_space<vmem>>, vector<4x2048xbf16>
    %c0_1 = arith.constant 0 : index
    %c0_2 = arith.constant 0 : index
    %1 = vector.load %arg2[%c0_1, %c0_2] : memref<4x32xbf16, #tpu.memory_space<vmem>>, vector<4x32xbf16>
    %cst = arith.constant dense<0.000000e+00> : vector<2048x32xf32>
    %2 = tpu.matmul %0, %1, %cst {dimension_numbers = #tpu.dot_dimension_numbers<[0], [0], [1], [1], [0, 1, 1, 1], [], []>} : vector<4x2048xbf16>, vector<4x32xbf16>, vector<2048x32xf32> -> vector<2048x32xf32>
    %3 = vector.shape_cast %2 : vector<2048x32xf32> to vector<8x256x32xf32>
    %4 = tpu.iota {dimensions = array<i32: 1>} : vector<8x256x32xi32>
    %c196_i32 = arith.constant 196 : i32
    %5 = vector.broadcast %c196_i32 : i32 to vector<8x256x32xi32>
    %6 = arith.cmpi slt, %4, %5 : vector<8x256x32xi32>
    %cst_3 = arith.constant 0xFF800000 : f32
    %7 = vector.broadcast %cst_3 : f32 to vector<8x256x32xf32>
    %8 = arith.select %6, %3, %7 : vector<8x256x32xi1>, vector<8x256x32xf32>
    %cst_4 = arith.constant dense<0xFF800000> : vector<8x32xf32>
    %9 = vector.multi_reduction <maximumf>, %8, %cst_4 [1] : vector<8x256x32xf32> to vector<8x32xf32>
    %10 = arith.truncf %9 : vector<8x32xf32> to vector<8x32xbf16>
    %c0_5 = arith.constant 0 : index
    %c0_6 = arith.constant 0 : index
    %11 = vector.load %arg3[%c0_5, %c0_6] : memref<32x64xbf16, #tpu.memory_space<vmem>>, vector<32x64xbf16>
    %cst_7 = arith.constant dense<0.000000e+00> : vector<8x64xf32>
    %12 = tpu.matmul %10, %11, %cst_7 {dimension_numbers = #tpu.dot_dimension_numbers<[1], [0], [0], [1], [0, 0, 1, 1], [], []>} : vector<8x32xbf16>, vector<32x64xbf16>, vector<8x64xf32> -> vector<8x64xf32>
    %c0_8 = arith.constant 0 : index
    %c0_9 = arith.constant 0 : index
    %13 = vector.load %arg4[%c0_8, %c0_9] : memref<1x64xf32, #tpu.memory_space<vmem>>, vector<1x64xf32>
    %14 = vector.broadcast %13 : vector<1x64xf32> to vector<8x64xf32>
    %15 = arith.addf %12, %14 : vector<8x64xf32>
    %c0_10 = arith.constant 0 : index
    %c0_11 = arith.constant 0 : index
    %16 = vector.load %arg5[%c0_10, %c0_11] : memref<128x128xbf16, #tpu.memory_space<vmem>>, vector<128x128xbf16>
    %c0_12 = arith.constant 0 : index
    %c0_13 = arith.constant 0 : index
    %17 = vector.load %arg6[%c0_12, %c0_13] : memref<128x32xbf16, #tpu.memory_space<vmem>>, vector<128x32xbf16>
    %c0_14 = arith.constant 0 : index
    %c0_15 = arith.constant 0 : index
    %18 = vector.load %arg7[%c0_14, %c0_15] : memref<32x32xbf16, #tpu.memory_space<vmem>>, vector<32x32xbf16>
    %cst_16 = arith.constant dense<0.000000e+00> : vector<128x32xf32>
    %19 = tpu.matmul %17, %18, %cst_16 {dimension_numbers = #tpu.dot_dimension_numbers<[1], [0], [0], [1], [0, 0, 1, 1], [], []>} : vector<128x32xbf16>, vector<32x32xbf16>, vector<128x32xf32> -> vector<128x32xf32>
    %20 = arith.truncf %19 : vector<128x32xf32> to vector<128x32xbf16>
    %cst_17 = arith.constant dense<0.000000e+00> : vector<128x32xf32>
    %21 = tpu.matmul %16, %20, %cst_17 {dimension_numbers = #tpu.dot_dimension_numbers<[1], [0], [0], [1], [0, 0, 1, 1], [], []>} : vector<128x128xbf16>, vector<128x32xbf16>, vector<128x32xf32> -> vector<128x32xf32>
    %cst_18 = arith.constant 0.000000e+00 : f32
    %22 = vector.broadcast %cst_18 : f32 to vector<128x32xf32>
    %23 = arith.cmpf oge, %21, %22 : vector<128x32xf32>
    %cst_19 = arith.constant 2.000000e-01 : f32
    %24 = vector.broadcast %cst_19 : f32 to vector<128x32xf32>
    %25 = arith.mulf %24, %21 : vector<128x32xf32>
    %26 = arith.select %23, %21, %25 : vector<128x32xi1>, vector<128x32xf32>
    %27 = arith.truncf %26 : vector<128x32xf32> to vector<128x32xbf16>
    %c0_20 = arith.constant 0 : index
    %c0_21 = arith.constant 0 : index
    %28 = vector.load %arg8[%c0_20, %c0_21] : memref<32x64xbf16, #tpu.memory_space<vmem>>, vector<32x64xbf16>
    %cst_22 = arith.constant dense<0.000000e+00> : vector<128x64xf32>
    %29 = tpu.matmul %27, %28, %cst_22 {dimension_numbers = #tpu.dot_dimension_numbers<[1], [0], [0], [1], [0, 0, 1, 1], [], []>} : vector<128x32xbf16>, vector<32x64xbf16>, vector<128x64xf32> -> vector<128x64xf32>
    %30 = arith.truncf %29 : vector<128x64xf32> to vector<128x64xbf16>
    %cst_23 = arith.constant dense<0.000000e+00> : vector<128x64xf32>
    %31 = tpu.matmul %16, %30, %cst_23 {dimension_numbers = #tpu.dot_dimension_numbers<[1], [0], [0], [1], [0, 0, 1, 1], [], []>} : vector<128x128xbf16>, vector<128x64xbf16>, vector<128x64xf32> -> vector<128x64xf32>
    %32 = arith.truncf %15 : vector<8x64xf32> to vector<8x64xbf16>
    %33 = arith.truncf %31 : vector<128x64xf32> to vector<128x64xbf16>
    %cst_24 = arith.constant dense<0.000000e+00> : vector<8x128xf32>
    %34 = tpu.matmul %32, %33, %cst_24 {dimension_numbers = #tpu.dot_dimension_numbers<[1], [1], [0], [0], [0, 0, 1, 0], [], []>} : vector<8x64xbf16>, vector<128x64xbf16>, vector<8x128xf32> -> vector<8x128xf32>
    %c0_25 = arith.constant 0 : index
    %c0_26 = arith.constant 0 : index
    %35 = vector.load %arg9[%c0_25, %c0_26] : memref<8x128xf32, #tpu.memory_space<vmem>>, vector<8x128xf32>
    tpu.vector_store %arg9[%c0_25, %c0_26], %34 {strides = array<i32>} : memref<8x128xf32, #tpu.memory_space<vmem>>, vector<8x128xf32>,
    return
  }
  func.func @transform_0(%arg0: i32) -> (i32, i32) {
    %c0_i32 = arith.constant 0 : i32
    %c0_i32_0 = arith.constant 0 : i32
    return %c0_i32, %arg0 : i32, i32
  }
  func.func @transform_1(%arg0: i32) -> (i32, i32) {
    %c0_i32 = arith.constant 0 : i32
    %c0_i32_0 = arith.constant 0 : i32
    %c0_i32_1 = arith.constant 0 : i32
    return %c0_i32, %c0_i32_0 : i32, i32
  }
  func.func @transform_2(%arg0: i32) -> (i32, i32) {
    %c0_i32 = arith.constant 0 : i32
    %c0_i32_0 = arith.constant 0 : i32
    %c0_i32_1 = arith.constant 0 : i32
    return %c0_i32, %c0_i32_0 : i32, i32
  }
  func.func @transform_3(%arg0: i32) -> (i32, i32) {
    %c0_i32 = arith.constant 0 : i32
    %c0_i32_0 = arith.constant 0 : i32
    %c0_i32_1 = arith.constant 0 : i32
    return %c0_i32, %c0_i32_0 : i32, i32
  }
  func.func @transform_4(%arg0: i32) -> (i32, i32) {
    %c0_i32 = arith.constant 0 : i32
    %c0_i32_0 = arith.constant 0 : i32
    %c0_i32_1 = arith.constant 0 : i32
    return %c0_i32, %c0_i32_0 : i32, i32
  }
  func.func @transform_5(%arg0: i32) -> (i32, i32) {
    %c0_i32 = arith.constant 0 : i32
    %c0_i32_0 = arith.constant 0 : i32
    %c0_i32_1 = arith.constant 0 : i32
    return %c0_i32, %c0_i32_0 : i32, i32
  }
  func.func @transform_6(%arg0: i32) -> (i32, i32) {
    %c0_i32 = arith.constant 0 : i32
    %c0_i32_0 = arith.constant 0 : i32
    %c0_i32_1 = arith.constant 0 : i32
    return %c0_i32, %c0_i32_0 : i32, i32
  }
  func.func @transform_7(%arg0: i32) -> (i32, i32) {
    %c0_i32 = arith.constant 0 : i32
    %c0_i32_0 = arith.constant 0 : i32
    %c0_i32_1 = arith.constant 0 : i32
    return %c0_i32, %c0_i32_0 : i32, i32
  }
  func.func @transform_8(%arg0: i32) -> (i32, i32) {
    %c0_i32 = arith.constant 0 : i32
    %c0_i32_0 = arith.constant 0 : i32
    return %arg0, %c0_i32 : i32, i32
  }
}

</mosaic_0001>

<bundles_post_ra>
// kernel: tpu_custom_call.1
= control target key start
LH: loop header
LB: loop body
LE: loop exit
PB: predicated region body
PF: predicated region fallthrough
CT: control target
= control target key end

     0   :  { %13 = vsyncpa [#allocation3], 0  ;;  %s5299_s0 = inlined_call_operand.hbm [shape: bf16[4,2048], index: 0, kind: input, shape index: {}]   ;;  %s5300_s1 = inlined_call_operand.vmem [shape: bf16[4,32], index: 1, kind: input, shape index: {}]   ;;  %s5301_s2 = inlined_call_operand.vmem [shape: bf16[32,64], index: 2, kind: input, shape index: {}]   ;;  %s5302_s3 = inlined_call_operand.hbm [shape: f32[1,64], index: 3, kind: input, shape index: {}]   ;;  %s5303_s4 = inlined_call_operand.vmem [shape: bf16[128,128], index: 4, kind: input, shape index: {}]   ;;  %s5304_s5 = inlined_call_operand.vmem [shape: bf16[128,32], index: 5, kind: input, shape index: {}]   ;;  %s5305_s6 = inlined_call_operand.hbm [shape: bf16[32,32], index: 6, kind: input, shape index: {}]   ;;  %s5306_s7 = inlined_call_operand.hbm [shape: bf16[32,64], index: 7, kind: input, shape index: {}]   ;;  %s5307_s8 = inlined_call_operand.hbm [shape: f32[8,128], index: 8, kind: output, shape index: {}]  }
   0x1   :  { %14 = vsyncpa [#allocation6], 0 }
   0x2   :  { %15 = vsyncpa [#allocation9], 0 }
   0x3   :  { %16 = vsyncpa [#allocation4], 0  ;;  %s4522_s27 = smov [#allocation5]   ;;  %s4523_s29 = smov [#allocation2]  }
   0x4   :  { %s37_s28 = sshll.u32 %s4522_s27, 4  ;;  %s23_s30 = sshll.u32 %s4523_s29, 4  ;;  %s38_s28 = int_to_ptr.vmem [resolvable:$true] %s37_s28  ;;  %s24_s30 = int_to_ptr.vmem [resolvable:$true] %s23_s30 }
   0x5   :  { %s4404_s11 = scalar_lea.hbm %s5302_s3, 16 }
   0x6   :  { %p4405_p0 = scmp.ne.s32.totalorder %s5302_s3, %s4404_s11  ;;  %p4408_p1 = scmp.lt.u32.totalorder %s4404_s11, %s5302_s3 }
   0x8   :  { %p4410_p2 = pnand %p4408_p1, %p4405_p0 }
   0xa   :  { %4413 = shalt.err (!%p4410_p2)
}
   0xb   :  { %s4414_s16 = scalar_lea.vmem %s38_s28, 16  ;;  %s4418_s17 = scalar_lea.vmem %s38_s28, 32 }
   0xc   :  { %p4415_p3 = scmp.ne.s32.totalorder %s38_s28, %s4414_s16  ;;  %p4419_p4 = scmp.lt.s32.totalorder %s38_s28, %s38_s28 }
   0xd   :  { %p4420_p5 = scmp.lt.s32.totalorder %s4418_s17, %s4414_s16 }
   0xf   :  { %p4421_p6 = por %p4420_p5, %p4419_p4 }
  0x11   :  { %p4422_p7 = pnand %p4421_p6, %p4415_p3 }
  0x13   :  { %4425 = shalt.err (!%p4422_p7)
}
  0x14   :  { %40 = dma.hbm_to_vmem [thread:$0]  %s5302_s3, 16, %s38_s28, [#allocation6]  }
  0x15   :  { %s4426_s22 = scalar_lea.hbm %s5299_s0, 512 }
  0x16   :  { %p4427_p8 = scmp.ne.s32.totalorder %s5299_s0, %s4426_s22  ;;  %p4430_p9 = scmp.lt.u32.totalorder %s4426_s22, %s5299_s0 }
  0x18   :  { %p4432_p10 = pnand %p4430_p9, %p4427_p8 }
  0x1a   :  { %4435 = shalt.err (!%p4432_p10)
}
  0x1b   :  { %s4436_s27 = scalar_lea.vmem %s24_s30, 512  ;;  %p4441_p12 = scmp.lt.s32.totalorder %s24_s30, %s24_s30 }
  0x1c   :  { %p4437_p11 = scmp.ne.s32.totalorder %s24_s30, %s4436_s27  ;;  %p4442_p13 = scmp.lt.s32.totalorder %s4436_s27, %s4436_s27 }
  0x1e   :  { %p4443_p0 = por %p4442_p13, %p4441_p12 }
  0x20   :  { %p4444_p1 = pnand %p4443_p0, %p4437_p11 }
  0x22   :  { %4447 = shalt.err (!%p4444_p1)
}
  0x23   :  { %26 = dma.hbm_to_vmem [thread:$0]  %s5299_s0, 512, %s24_s30, [#allocation3]  }
  0x24   :  { %s4524_s29 = smov [#allocation7]   ;;  %s4448_s12 = scalar_lea.hbm %s5305_s6, 256 }
  0x25   :  { %s50_s9 = sshll.u32 %s4524_s29, 4  ;;  %p4449_p2 = scmp.ne.s32.totalorder %s5305_s6, %s4448_s12  ;;  %s51_s9 = int_to_ptr.vmem [resolvable:$true] %s50_s9 }
  0x26   :  { %p4452_p3 = scmp.lt.u32.totalorder %s4448_s12, %s5305_s6 }
  0x28   :  { %p4454_p4 = pnand %p4452_p3, %p4449_p2 }
  0x2a   :  { %4457 = shalt.err (!%p4454_p4)
}
  0x2b   :  { %s4458_s17 = scalar_lea.vmem %s51_s9, 256  ;;  %p4463_p6 = scmp.lt.s32.totalorder %s51_s9, %s51_s9 }
  0x2c   :  { %p4459_p5 = scmp.ne.s32.totalorder %s51_s9, %s4458_s17  ;;  %p4464_p7 = scmp.lt.s32.totalorder %s4458_s17, %s4458_s17 }
  0x2e   :  { %p4465_p8 = por %p4464_p7, %p4463_p6 }
  0x30   :  { %p4466_p9 = pnand %p4465_p8, %p4459_p5 }
  0x32   :  { %4469 = shalt.err (!%p4466_p9)
}
  0x33   :  { %s4525_s0 = smov 64   ;;  %s4526_s30 = smov 4  }
  0x34   :  { %56 = dma.hbm_to_vmem [thread:$0]  %s5305_s6, 256, %s51_s9, [#allocation6], %s4525_s0, %s4525_s0, %s4526_s30  }
  0x35   :  { %s4527_s20 = smov [#allocation8]   ;;  %s4470_s24 = scalar_lea.hbm %s5306_s7, 256 }
  0x36   :  { %s62_s21 = sshll.u32 %s4527_s20, 4  ;;  %p4471_p10 = scmp.ne.s32.totalorder %s5306_s7, %s4470_s24  ;;  %s63_s21 = int_to_ptr.vmem [resolvable:$true] %s62_s21 }
  0x37   :  { %p4474_p11 = scmp.lt.u32.totalorder %s4470_s24, %s5306_s7 }
  0x39   :  { %p4476_p12 = pnand %p4474_p11, %p4471_p10 }
  0x3b   :  { %4479 = shalt.err (!%p4476_p12)
}
  0x3c   :  { %s4480_s28 = scalar_lea.vmem %s63_s21, 256  ;;  %p4485_p0 = scmp.lt.s32.totalorder %s63_s21, %s63_s21 }
  0x3d   :  { %p4481_p13 = scmp.ne.s32.totalorder %s63_s21, %s4480_s28  ;;  %p4486_p1 = scmp.lt.s32.totalorder %s4480_s28, %s4480_s28 }
  0x3f   :  { %p4487_p2 = por %p4486_p1, %p4485_p0 }
  0x41   :  { %p4488_p3 = pnand %p4487_p2, %p4481_p13 }
  0x43   :  { %4491 = shalt.err (!%p4488_p3)
}
  0x44   :  { %68 = dma.hbm_to_vmem [thread:$0]  %s5306_s7, 256, %s63_s21, [#allocation9], %s4525_s0, %s4525_s0, %s4526_s30  }
  0x45   :  { %4514 = dma.done.wait [#allocation3], 512  }
  0x46   :  { %4515 = vsyncadd [#allocation3], 4294966784 }
  0x47   :  { %4516 = dma.done.wait [#allocation6], 272  }
  0x48   :  { %4517 = vsyncadd [#allocation6], 4294967024 }
  0x49   :  { %4518 = dma.done.wait [#allocation9], 256  }
  0x4a   :  { %4519 = vsyncadd [#allocation9], 4294967040  ;;  %v95_v0 = vlaneseq  ;;  %v4528_v1 = vmov 1983009808   ;;  %vm816_vm0 = vcmask 1041408   ;;  %v82_v6 = vld [vmem:[#allocation2] sm:$0xff] }
  0x4b   :  { %v93_v2 = vunpack.c.l.s4 %v4528_v1  ;;  %v86_v7 = vld [vmem:[%s5300_s1] sm:$0x3]  ;;  %v91_v9 = vcombine.high %v82_v6, %v82_v6  ;;  %v83_v14 = vld [vmem:[#allocation2 + $0x8] sm:$0xff]  ;;  %v84_v17 = vld [vmem:[#allocation2 + $0x10] sm:$0xff]  ;;  %vm431_vm1 = vcmask 31744   ;;  %vm2198_vm2 = vcmask 261120  }
  0x4c   :  { %v4625_v3 = vshrl.u32 %v95_v0, 7  ;;  %4365 = vmatprep.subr.msk.bf16.mxu0 %vm816_vm0, %v86_v7  ;;  %v818_v10 = vsel %vm816_vm0, %v86_v7, 0  ;;  %4366 = vmatprep.subr.msk.bf16.mxu1 %vm816_vm0, %v86_v7  ;;  %v108_v18 = vcombine.high %v83_v14, %v83_v14  ;;  %v125_v19 = vcombine.high %v84_v17, %v84_v17  ;;  %v85_v44 = vld [vmem:[#allocation2 + $0x18] sm:$0xff] }
  0x4d   :  { %v94_v4 = vunpack.c.0.s8 %v93_v2  ;;  %3974 = vmatpush3.bf16.msra.mxu0 %v818_v10  ;;  %4364 = vmatpush3.bf16.msra.mxu1 %v818_v10  ;;  %vm2786_vm4 = vcmask 1041409   ;;  %vm2788_vm5 = vcmask 1042434   ;;  %vm4530_vm6 = vmmov 0  }
  0x4e   :  { %vm2790_vm7 = vcmask 1043459   ;;  %vm2792_vm8 = vcmask 1044484   ;;  %vm2794_vm9 = vcmask 1045509   ;;  %vm2796_vm10 = vcmask 1046534  }
  0x4f   :  { %v4628_v5 = vsub.s32 %v94_v4, %v4625_v3  ;;  %vm2798_vm11 = vcmask 1047559  }
  0x51   :  { %v98_v8 = vrot.slane %v82_v6, %v4628_v5  ;;  %v105_v11 = vrot.slane %v91_v9, %v4628_v5  ;;  %v115_v15 = vrot.slane %v83_v14, %v4628_v5  ;;  %v122_v20 = vrot.slane %v108_v18, %v4628_v5 }
  0x52   :  { %v139_v21 = vrot.slane %v125_v19, %v4628_v5  ;;  %v132_v45 = vrot.slane %v84_v17, %v4628_v5  ;;  %v149_v47 = vrot.slane %v85_v44, %v4628_v5  ;;  %v142_v14 = vcombine.high %v85_v44, %v85_v44 }
  0x53   :  { %175 = vxpose.xlu0.c.b16.start.end [1/1] (short) %v98_v8, 128  ;;  %207 = vxpose.xlu1.c.b16.start.end [1/1] (short) %v105_v11, 128  ;;  %v106_v12 = vcombine.high %v98_v8, %v98_v8  ;;  %v107_v13 = vcombine.high %v105_v11, %v105_v11  ;;  %v123_v16 = vcombine.high %v115_v15, %v115_v15 }
  0x54   :  { %v124_v28 = vcombine.high %v122_v20, %v122_v20  ;;  %v141_v30 = vcombine.high %v139_v21, %v139_v21  ;;  %v140_v62 = vcombine.high %v132_v45, %v132_v45  ;;  %v157_v63 = vcombine.high %v149_v47, %v149_v47 }
  0x55   :  { %v156_v17 = vrot.slane %v142_v14, %v4628_v5 }
  0x57   :  { %v158_v19 = vcombine.high %v156_v17, %v156_v17 }
  0x70   :  { %191 = vxpose.xlu0.c.b16.start.end [1/1] (short) %v106_v12, 128  ;;  %223 = vxpose.xlu1.c.b16.start.end [1/1] (short) %v107_v13, 128 }
  0x8d   :  { %239 = vxpose.xlu0.c.b16.start.end [1/1] (short) %v115_v15, 128  ;;  %255 = vxpose.xlu1.c.b16.start.end [1/1] (short) %v123_v16, 128 }
  0xaa   :  { %271 = vxpose.xlu0.c.b16.start.end [1/1] (short) %v122_v20, 128  ;;  %335 = vxpose.xlu1.c.b16.start.end [1/1] (short) %v139_v21, 128 }
  0xb9   :  { %v183_v22 = vpop.trf.xlu0  ;;  %v215_v23 = vpop.trf.xlu1 }
  0xba   :  { %3975 = vmatprep.mubr.msk.bf16.mxu0 %vm431_vm1, %v183_v22 }
  0xbd   :  { %v184_v24 = vpop.trf.xlu0  ;;  %v216_v25 = vpop.trf.xlu1 }
  0xbe   :  { %3976 = vmatmul.mubr.msk.bf16.vlgmr.msra.gmra.mrb[0].mxu0 %vm431_vm1, %v184_v24 }
  0xc1   :  { %v185_v26 = vpop.trf.xlu0  ;;  %v217_v27 = vpop.trf.xlu1 }
  0xc2   :  { %3979 = vmatprep.mubr.msk.bf16.mxu0 %vm431_vm1, %v185_v26 }
  0xc5   :  { %v186_v29 = vpop.trf.xlu0  ;;  %v218_v31 = vpop.trf.xlu1 }
  0xc6   :  { %3980 = vmatmul.mubr.msk.bf16.gmra.mrb[4].mxu0 %vm431_vm1, %v186_v29 }
  0xc7   :  { %287 = vxpose.xlu0.c.b16.start.end [1/1] (short) %v124_v28, 128  ;;  %351 = vxpose.xlu1.c.b16.start.end [1/1] (short) %v141_v30, 128 }
  0xc9   :  { %v187_v32 = vpop.trf.xlu0  ;;  %v219_v33 = vpop.trf.xlu1 }
  0xca   :  { %3983 = vmatprep.mubr.msk.bf16.mxu0 %vm431_vm1, %v187_v32 }
  0xcd   :  { %v188_v34 = vpop.trf.xlu0  ;;  %v220_v35 = vpop.trf.xlu1 }
  0xce   :  { %3984 = vmatmul.mubr.msk.bf16.gmra.mrb[8].mxu0 %vm431_vm1, %v188_v34 }
  0xd1   :  { %v189_v36 = vpop.trf.xlu0  ;;  %v221_v37 = vpop.trf.xlu1 }
  0xd2   :  { %3987 = vmatprep.mubr.msk.bf16.mxu0 %vm431_vm1, %v189_v36 }
  0xd5   :  { %v190_v38 = vpop.trf.xlu0  ;;  %v222_v39 = vpop.trf.xlu1 }
  0xd6   :  { %3988 = vmatmul.mubr.msk.bf16.gmra.mrb[12].mxu0 %vm431_vm1, %v190_v38 }
  0xd9   :  { %v199_v40 = vpop.trf.xlu0  ;;  %v231_v41 = vpop.trf.xlu1 }
  0xda   :  { %3991 = vmatprep.mubr.msk.bf16.mxu0 %vm431_vm1, %v199_v40 }
  0xdd   :  { %v200_v42 = vpop.trf.xlu0  ;;  %v232_v43 = vpop.trf.xlu1 }
  0xde   :  { %3992 = vmatmul.mubr.msk.bf16.gmra.mrb[16].mxu0 %vm431_vm1, %v200_v42 }
  0xe1   :  { %v201_v46 = vpop.trf.xlu0  ;;  %v233_v48 = vpop.trf.xlu1 }
  0xe2   :  { %3995 = vmatprep.mubr.msk.bf16.mxu0 %vm431_vm1, %v201_v46 }
  0xe4   :  { %303 = vxpose.xlu0.c.b16.start.end [1/1] (short) %v132_v45, 128  ;;  %367 = vxpose.xlu1.c.b16.start.end [1/1] (short) %v149_v47, 128 }
  0xe5   :  { %v202_v49 = vpop.trf.xlu0  ;;  %v234_v50 = vpop.trf.xlu1 }
  0xe6   :  { %3996 = vmatmul.mubr.msk.bf16.gmra.mrb[20].mxu0 %vm431_vm1, %v202_v49 }
  0xe9   :  { %v203_v51 = vpop.trf.xlu0  ;;  %v235_v52 = vpop.trf.xlu1 }
  0xea   :  { %3999 = vmatprep.mubr.msk.bf16.mxu0 %vm431_vm1, %v203_v51 }
  0xed   :  { %v204_v53 = vpop.trf.xlu0  ;;  %v236_v54 = vpop.trf.xlu1 }
  0xee   :  { %4000 = vmatmul.mubr.msk.bf16.gmra.mrb[24].mxu0 %vm431_vm1, %v204_v53 }
  0xf1   :  { %v205_v55 = vpop.trf.xlu0  ;;  %v237_v56 = vpop.trf.xlu1 }
  0xf2   :  { %4003 = vmatprep.mubr.msk.bf16.mxu0 %vm431_vm1, %v205_v55 }
  0xf5   :  { %v206_v57 = vpop.trf.xlu0  ;;  %v238_v58 = vpop.trf.xlu1 }
  0xf6   :  { %4004 = vmatmul.mubr.msk.bf16.gmra.mrb[28].mxu0 %vm431_vm1, %v206_v57 }
  0xf7   :  { %4007 = vmatprep.mubr.msk.bf16.mxu0 %vm431_vm1, %v215_v23 }
  0xf9   :  { %v247_v59 = vpop.trf.xlu0  ;;  %v4657_v60 = vpop.trf.xlu1 }
  0xfd   :  { %v248_v61 = vpop.trf.xlu0  ;;  %v4661_v0 = vpop.trf.xlu1 }
  0xfe   :  { %4008 = vmatmul.mubr.msk.bf16.gmra.mrb[32].mxu0 %vm431_vm1, %v216_v25 }
  0xff   :  { %4011 = vmatprep.mubr.msk.bf16.mxu0 %vm431_vm1, %v217_v27 }
 0x101   :  { %v249_v1 = vpop.trf.xlu0  ;;  %319 = vxpose.xlu0.c.b16.start.end [1/1] (short) %v140_v62, 128  ;;  %v4663_v2 = vpop.trf.xlu1  ;;  %383 = vxpose.xlu1.c.b16.start.end [1/1] (short) %v157_v63, 128 }
 0x105   :  { %v250_v4 = vpop.trf.xlu0  ;;  %v4667_v6 = vpop.trf.xlu1 }
 0x106   :  { %4012 = vmatmul.mubr.msk.bf16.gmra.mrb[36].mxu0 %vm431_vm1, %v218_v31 }
 0x107   :  { %4015 = vmatprep.mubr.msk.bf16.mxu0 %vm431_vm1, %v219_v33 }
 0x109   :  { %v251_v7 = vpop.trf.xlu0  ;;  %v4669_v8 = vpop.trf.xlu1 }
 0x10d   :  { %v252_v9 = vpop.trf.xlu0  ;;  %v4673_v10 = vpop.trf.xlu1 }
 0x10e   :  { %4016 = vmatmul.mubr.msk.bf16.gmra.mrb[40].mxu0 %vm431_vm1, %v220_v35 }
 0x10f   :  { %4019 = vmatprep.mubr.msk.bf16.mxu0 %vm431_vm1, %v221_v37 }
 0x111   :  { %v253_v11 = vpop.trf.xlu0  ;;  %v4675_v12 = vpop.trf.xlu1 }
 0x115   :  { %v4677_v13 = vpop.trf.xlu0  ;;  %v4681_v15 = vpop.trf.xlu1 }
 0x116   :  { %4020 = vmatmul.mubr.msk.bf16.gmra.mrb[44].mxu0 %vm431_vm1, %v222_v39 }
 0x117   :  { %4023 = vmatprep.mubr.msk.bf16.mxu0 %vm431_vm1, %v231_v41 }
 0x119   :  { %v4683_v16 = vpop.trf.xlu0  ;;  %v4686_v18 = vpop.trf.xlu1 }
 0x11d   :  { %v4688_v20 = vpop.trf.xlu0  ;;  %v4692_v21 = vpop.trf.xlu1 }
 0x11e   :  { %4024 = vmatmul.mubr.msk.bf16.gmra.mrb[48].mxu0 %vm431_vm1, %v232_v43  ;;  %399 = vxpose.xlu0.c.b16.start.end [1/1] (short) %v156_v17, 128 }
 0x11f   :  { %4027 = vmatprep.mubr.msk.bf16.mxu0 %vm431_vm1, %v233_v48  ;;  %415 = vxpose.xlu1.c.b16.start.end [1/1] (short) %v158_v19, 128 }
 0x121   :  { %v4694_v22 = vpop.trf.xlu0  ;;  %v4696_v23 = vpop.trf.xlu1 }
 0x125   :  { %v4698_v24 = vpop.trf.xlu0  ;;  %v4702_v5 = vpop.trf.xlu1 }
 0x126   :  { %4028 = vmatmul.mubr.msk.bf16.gmra.mrb[52].mxu0 %vm431_vm1, %v234_v50 }
 0x127   :  { %4031 = vmatprep.mubr.msk.bf16.mxu0 %vm431_vm1, %v235_v52 }
 0x129   :  { %v4704_v25 = vpop.trf.xlu0  ;;  %v4706_v26 = vpop.trf.xlu1 }
 0x12d   :  { %v4708_v27 = vpop.trf.xlu0  ;;  %v4712_v28 = vpop.trf.xlu1 }
 0x12e   :  { %4032 = vmatmul.mubr.msk.bf16.gmra.mrb[56].mxu0 %vm431_vm1, %v236_v54 }
 0x12f   :  { %4035 = vmatprep.mubr.msk.bf16.mxu0 %vm431_vm1, %v237_v56 }
 0x131   :  { %v4714_v29 = vpop.trf.xlu0  ;;  %v349_v30 = vpop.trf.xlu1 }
 0x132   :  { %4147 = vmatprep.mubr.msk.bf16.mxu1 %vm431_vm1, %v349_v30 }
 0x135   :  { %v4717_v31 = vpop.trf.xlu0  ;;  %v350_v32 = vpop.trf.xlu1 }
 0x136   :  { %4036 = vmatmul.mubr.msk.bf16.gmra.mrb[60].mxu0 %vm431_vm1, %v238_v58  ;;  %4148 = vmatmul.mubr.msk.bf16.vlgmr.msra.gmra.mrb[0].mxu1 %vm431_vm1, %v350_v32 }
 0x137   :  { %4039 = vmatprep.mubr.msk.bf16.mxu0 %vm431_vm1, %v247_v59 }
 0x139   :  { %v4722_v33 = vpop.trf.xlu0  ;;  %v359_v34 = vpop.trf.xlu1 }
 0x13a   :  { %4151 = vmatprep.mubr.msk.bf16.mxu1 %vm431_vm1, %v359_v34 }
 0x13d   :  { %v4725_v35 = vpop.trf.xlu0  ;;  %v360_v36 = vpop.trf.xlu1 }
 0x13e   :  { %4040 = vmatmul.mubr.msk.bf16.gmra.mrb[64].mxu0 %vm431_vm1, %v248_v61  ;;  %4152 = vmatmul.mubr.msk.bf16.gmra.mrb[4].mxu1 %vm431_vm1, %v360_v36 }
 0x13f   :  { %4043 = vmatprep.mubr.msk.bf16.mxu0 %vm431_vm1, %v249_v1 }
 0x141   :  { %v4730_v37 = vpop.trf.xlu0  ;;  %v361_v38 = vpop.trf.xlu1 }
 0x142   :  { %4155 = vmatprep.mubr.msk.bf16.mxu1 %vm431_vm1, %v361_v38 }
 0x145   :  { %v4733_v39 = vpop.trf.xlu0  ;;  %v362_v40 = vpop.trf.xlu1 }
 0x146   :  { %4044 = vmatmul.mubr.msk.bf16.gmra.mrb[68].mxu0 %vm431_vm1, %v250_v4  ;;  %4156 = vmatmul.mubr.msk.bf16.gmra.mrb[8].mxu1 %vm431_vm1, %v362_v40 }
 0x147   :  { %4047 = vmatprep.mubr.msk.bf16.mxu0 %vm431_vm1, %v251_v7 }
 0x149   :  { %v4738_v41 = vpop.trf.xlu0  ;;  %v363_v42 = vpop.trf.xlu1 }
 0x14a   :  { %4159 = vmatprep.mubr.msk.bf16.mxu1 %vm431_vm1, %v363_v42 }
 0x14d   :  { %v4741_v43 = vpop.trf.xlu0  ;;  %v364_v44 = vpop.trf.xlu1 }
 0x14e   :  { %4048 = vmatmul.mubr.msk.bf16.gmra.mrb[72].mxu0 %vm431_vm1, %v252_v9  ;;  %4160 = vmatmul.mubr.msk.bf16.gmra.mrb[12].mxu1 %vm431_vm1, %v364_v44 }
 0x14f   :  { %4051 = vmatprep.mubr.msk.bf16.mxu0 %vm431_vm1, %v253_v11 }
 0x151   :  { %v4746_v45 = vpop.trf.xlu0  ;;  %v365_v46 = vpop.trf.xlu1 }
 0x152   :  { %4163 = vmatprep.mubr.msk.bf16.mxu1 %vm431_vm1, %v365_v46 }
 0x155   :  { %v4749_v47 = vpop.trf.xlu0  ;;  %v366_v48 = vpop.trf.xlu1 }
 0x156   :  { %4052 = vmatmul.mubr.msk.bf16.gmra.mrb[76].mxu0 %vm431_vm1, %v4677_v13  ;;  %4164 = vmatmul.mubr.msk.bf16.gmra.mrb[16].mxu1 %vm431_vm1, %v366_v48 }
 0x157   :  { %4055 = vmatprep.mubr.msk.bf16.mxu0 %vm431_vm1, %v4657_v60 }
 0x159   :  { %v4756_v49 = vpop.trf.xlu0  ;;  %v375_v50 = vpop.trf.xlu1 }
 0x15a   :  { %4167 = vmatprep.mubr.msk.bf16.mxu1 %vm431_vm1, %v375_v50 }
 0x15d   :  { %v4759_v51 = vpop.trf.xlu0  ;;  %v376_v52 = vpop.trf.xlu1 }
 0x15e   :  { %4056 = vmatmul.mubr.msk.bf16.gmra.mrb[80].mxu0 %vm431_vm1, %v4661_v0  ;;  %4168 = vmatmul.mubr.msk.bf16.gmra.mrb[20].mxu1 %vm431_vm1, %v376_v52 }
 0x15f   :  { %4059 = vmatprep.mubr.msk.bf16.mxu0 %vm431_vm1, %v4663_v2 }
 0x161   :  { %v4766_v53 = vpop.trf.xlu0  ;;  %v377_v54 = vpop.trf.xlu1 }
 0x162   :  { %4171 = vmatprep.mubr.msk.bf16.mxu1 %vm431_vm1, %v377_v54 }
 0x165   :  { %v4769_v55 = vpop.trf.xlu0  ;;  %v378_v56 = vpop.trf.xlu1 }
 0x166   :  { %4060 = vmatmul.mubr.msk.bf16.gmra.mrb[84].mxu0 %vm431_vm1, %v4667_v6  ;;  %4172 = vmatmul.mubr.msk.bf16.gmra.mrb[24].mxu1 %vm431_vm1, %v378_v56 }
 0x167   :  { %4063 = vmatprep.mubr.msk.bf16.mxu0 %vm431_vm1, %v4669_v8 }
 0x169   :  { %v4776_v57 = vpop.trf.xlu0  ;;  %v379_v58 = vpop.trf.xlu1 }
 0x16a   :  { %4175 = vmatprep.mubr.msk.bf16.mxu1 %vm431_vm1, %v379_v58 }
 0x16d   :  { %v4779_v59 = vpop.trf.xlu0  ;;  %v380_v60 = vpop.trf.xlu1 }
 0x16e   :  { %4064 = vmatmul.mubr.msk.bf16.gmra.mrb[88].mxu0 %vm431_vm1, %v4673_v10  ;;  %4176 = vmatmul.mubr.msk.bf16.gmra.mrb[28].mxu1 %vm431_vm1, %v380_v60 }
 0x16f   :  { %4067 = vmatprep.mubr.msk.bf16.mxu0 %vm431_vm1, %v4675_v12 }
 0x171   :  { %v4786_v61 = vpop.trf.xlu0  ;;  %v381_v62 = vpop.trf.xlu1 }
 0x172   :  { %4179 = vmatprep.mubr.msk.bf16.mxu1 %vm431_vm1, %v381_v62 }
 0x175   :  { %v4789_v63 = vpop.trf.xlu0  ;;  %v382_v0 = vpop.trf.xlu1 }
 0x176   :  { %4068 = vmatmul.mubr.msk.bf16.gmra.mrb[92].mxu0 %vm431_vm1, %v4681_v15  ;;  %4180 = vmatmul.mubr.msk.bf16.gmra.mrb[32].mxu1 %vm431_vm1, %v382_v0 }
 0x177   :  { %4071 = vmatprep.mubr.msk.bf16.mxu0 %vm431_vm1, %v4683_v16 }
 0x179   :  { %v4796_v1 = vpop.trf.xlu0  ;;  %v391_v2 = vpop.trf.xlu1 }
 0x17a   :  { %4183 = vmatprep.mubr.msk.bf16.mxu1 %vm431_vm1, %v391_v2 }
 0x17d   :  { %v4799_v4 = vpop.trf.xlu0  ;;  %v392_v6 = vpop.trf.xlu1 }
 0x17e   :  { %4072 = vmatmul.mubr.msk.bf16.gmra.mrb[96].mxu0 %vm431_vm1, %v4688_v20  ;;  %4184 = vmatmul.mubr.msk.bf16.gmra.mrb[36].mxu1 %vm431_vm1, %v392_v6 }
 0x17f   :  { %4075 = vmatprep.mubr.msk.bf16.mxu0 %vm431_vm1, %v4694_v22 }
 0x181   :  { %v4806_v7 = vpop.trf.xlu0  ;;  %v393_v8 = vpop.trf.xlu1 }
 0x182   :  { %4187 = vmatprep.mubr.msk.bf16.mxu1 %vm431_vm1, %v393_v8 }
 0x185   :  { %v4809_v9 = vpop.trf.xlu0  ;;  %v394_v10 = vpop.trf.xlu1 }
 0x186   :  { %4076 = vmatmul.mubr.msk.bf16.gmra.mrb[100].mxu0 %vm431_vm1, %v4698_v24  ;;  %4188 = vmatmul.mubr.msk.bf16.gmra.mrb[40].mxu1 %vm431_vm1, %v394_v10 }
 0x187   :  { %4079 = vmatprep.mubr.msk.bf16.mxu0 %vm431_vm1, %v4704_v25 }
 0x189   :  { %v4816_v11 = vpop.trf.xlu0  ;;  %v395_v12 = vpop.trf.xlu1 }
 0x18a   :  { %4191 = vmatprep.mubr.msk.bf16.mxu1 %vm431_vm1, %v395_v12 }
 0x18d   :  { %v4819_v13 = vpop.trf.xlu0  ;;  %v396_v14 = vpop.trf.xlu1 }
 0x18e   :  { %4080 = vmatmul.mubr.msk.bf16.gmra.mrb[104].mxu0 %vm431_vm1, %v4708_v27  ;;  %4192 = vmatmul.mubr.msk.bf16.gmra.mrb[44].mxu1 %vm431_vm1, %v396_v14 }
 0x18f   :  { %4083 = vmatprep.mubr.msk.bf16.mxu0 %vm431_vm1, %v4714_v29 }
 0x191   :  { %v3977_v15 = vpop.f32.mrb[0].mxu0  ;;  %v4826_v16 = vpop.trf.xlu0 }
 0x192   :  { %v854_v17 = vpop.f32.mrb[1].mxu0  ;;  %v397_v20 = vpop.trf.xlu1  ;;  %v2202_v30 = vsel %vm2198_vm2, %v3977_v15, -inf }
 0x193   :  { %v3978_v19 = vpop.f32.mrb[2].mxu0  ;;  %4195 = vmatprep.mubr.msk.bf16.mxu1 %vm431_vm1, %v397_v20  ;;  %v2199_v24 = vsel %vm2198_vm2, %v854_v17, -inf }
 0x194   :  { %v857_v22 = vpop.f32.mrb[3].mxu0  ;;  %v2204_v36 = vsel %vm2198_vm2, %v3978_v19, -inf }
 0x195   :  { %v2200_v25 = vsel %vm2198_vm2, %v857_v22, -inf  ;;  %v4831_v27 = vpop.trf.xlu0 }
 0x196   :  { %v2201_v29 = vmax.f32 %v2199_v24, %v2200_v25  ;;  %4084 = vmatmul.mubr.msk.bf16.gmra.mrb[108].mxu0 %vm431_vm1, %v4717_v31  ;;  %v398_v32 = vpop.trf.xlu1 }
 0x197   :  { %4087 = vmatprep.mubr.msk.bf16.mxu0 %vm431_vm1, %v4722_v33  ;;  %4196 = vmatmul.mubr.msk.bf16.gmra.mrb[48].mxu1 %vm431_vm1, %v398_v32 }
 0x198   :  { %v2203_v34 = vmax.f32 %v2201_v29, %v2202_v30 }
 0x199   :  { %v3981_v38 = vpop.f32.mrb[4].mxu0  ;;  %v407_v40 = vpop.trf.xlu0 }
 0x19a   :  { %v870_v42 = vpop.f32.mrb[5].mxu0  ;;  %v2205_v44 = vmax.f32 %v2203_v34, %v2204_v36  ;;  %4199 = vmatprep.mubr.msk.bf16.mxu1 %vm431_vm1, %v407_v40  ;;  %v2210_v56 = vsel %vm2198_vm2, %v3981_v38, -inf }
 0x19b   :  { %v2206_v46 = vsel %vm2198_vm2, %v870_v42, -inf  ;;  %v3982_v31 = vpop.f32.mrb[6].mxu0  ;;  %v423_v42 = vpop.trf.xlu1 }
 0x19c   :  { %v2207_v48 = vmax.f32 %v2205_v44, %v2206_v46  ;;  %v873_v50 = vpop.f32.mrb[7].mxu0  ;;  %v2212_v60 = vsel %vm2198_vm2, %v3982_v31, -inf }
 0x19d   :  { %v2208_v52 = vsel %vm2198_vm2, %v873_v50, -inf  ;;  %v408_v33 = vpop.trf.xlu0 }
 0x19e   :  { %v2209_v54 = vmax.f32 %v2207_v48, %v2208_v52  ;;  %4088 = vmatmul.mubr.msk.bf16.gmra.mrb[112].mxu0 %vm431_vm1, %v4725_v35 }
 0x19f   :  { %4091 = vmatprep.mubr.msk.bf16.mxu0 %vm431_vm1, %v4730_v37  ;;  %4200 = vmatmul.mubr.msk.bf16.gmra.mrb[52].mxu1 %vm431_vm1, %v408_v33 }
 0x1a0   :  { %v2211_v58 = vmax.f32 %v2209_v54, %v2210_v56 }
 0x1a1   :  { %v3985_v62 = vpop.f32.mrb[8].mxu0  ;;  %v409_v0 = vpop.trf.xlu0 }
 0x1a2   :  { %v886_v2 = vpop.f32.mrb[9].mxu0  ;;  %v2213_v6 = vmax.f32 %v2211_v58, %v2212_v60  ;;  %4203 = vmatprep.mubr.msk.bf16.mxu1 %vm431_vm1, %v409_v0  ;;  %v2218_v17 = vsel %vm2198_vm2, %v3985_v62, -inf  ;;  %v424_v60 = vpop.trf.xlu1 }
 0x1a3   :  { %v2214_v8 = vsel %vm2198_vm2, %v886_v2, -inf  ;;  %v3986_v10 = vpop.f32.mrb[10].mxu0 }
 0x1a4   :  { %v2215_v35 = vmax.f32 %v2213_v6, %v2214_v8  ;;  %v889_v12 = vpop.f32.mrb[11].mxu0  ;;  %v2220_v20 = vsel %vm2198_vm2, %v3986_v10, -inf }
 0x1a5   :  { %v2216_v14 = vsel %vm2198_vm2, %v889_v12, -inf  ;;  %v410_v15 = vpop.trf.xlu0 }
 0x1a6   :  { %v2217_v37 = vmax.f32 %v2215_v35, %v2216_v14  ;;  %4092 = vmatmul.mubr.msk.bf16.gmra.mrb[116].mxu0 %vm431_vm1, %v4733_v39 }
 0x1a7   :  { %4095 = vmatprep.mubr.msk.bf16.mxu0 %vm431_vm1, %v4738_v41  ;;  %4204 = vmatmul.mubr.msk.bf16.gmra.mrb[56].mxu1 %vm431_vm1, %v410_v15  ;;  %v425_v15 = vpop.trf.xlu1 }
 0x1a8   :  { %v2219_v19 = vmax.f32 %v2217_v37, %v2218_v17  ;;  %v4883_v17 = vadd.s32 192, %v4625_v3 }
 0x1a9   :  { %v3989_v22 = vpop.f32.mrb[12].mxu0  ;;  %v411_v24 = vpop.trf.xlu0 }
 0x1aa   :  { %v902_v25 = vpop.f32.mrb[13].mxu0  ;;  %v2221_v29 = vmax.f32 %v2219_v19, %v2220_v20  ;;  %4207 = vmatprep.mubr.msk.bf16.mxu1 %vm431_vm1, %v411_v24  ;;  %v2226_v40 = vsel %vm2198_vm2, %v3989_v22, -inf  ;;  %vm1934_vm3 = vcmp.lt.s32.totalorder %v4883_v17, 196 }
 0x1ab   :  { %v2222_v30 = vsel %vm2198_vm2, %v902_v25, -inf  ;;  %v3990_v32 = vpop.f32.mrb[14].mxu0  ;;  %v426_v25 = vpop.trf.xlu1 }
 0x1ac   :  { %v2223_v39 = vmax.f32 %v2221_v29, %v2222_v30  ;;  %v905_v34 = vpop.f32.mrb[15].mxu0  ;;  %v2228_v46 = vsel %vm2198_vm2, %v3990_v32, -inf }
 0x1ad   :  { %v2224_v36 = vsel %vm2198_vm2, %v905_v34, -inf  ;;  %v412_v38 = vpop.trf.xlu0 }
 0x1ae   :  { %v2225_v41 = vmax.f32 %v2223_v39, %v2224_v36  ;;  %4096 = vmatmul.mubr.msk.bf16.gmra.mrb[120].mxu0 %vm431_vm1, %v4741_v43 }
 0x1af   :  { %4099 = vmatprep.mubr.msk.bf16.mxu0 %vm431_vm1, %v4746_v45  ;;  %4208 = vmatmul.mubr.msk.bf16.gmra.mrb[60].mxu1 %vm431_vm1, %v412_v38  ;;  %v427_v36 = vpop.trf.xlu1 }
 0x1b0   :  { %v2227_v44 = vmax.f32 %v2225_v41, %v2226_v40 }
 0x1b1   :  { %v3993_v31 = vpop.f32.mrb[16].mxu0  ;;  %v413_v48 = vpop.trf.xlu0 }
 0x1b2   :  { %v918_v50 = vpop.f32.mrb[17].mxu0  ;;  %v2229_v52 = vmax.f32 %v2227_v44, %v2228_v46  ;;  %4211 = vmatprep.mubr.msk.bf16.mxu1 %vm431_vm1, %v413_v48  ;;  %v2234_v0 = vsel %vm2198_vm2, %v3993_v31, -inf }
 0x1b3   :  { %v2230_v33 = vsel %vm2198_vm2, %v918_v50, -inf  ;;  %v3994_v43 = vpop.f32.mrb[18].mxu0  ;;  %v428_v44 = vpop.trf.xlu1 }
 0x1b4   :  { %v2231_v54 = vmax.f32 %v2229_v52, %v2230_v33  ;;  %v921_v56 = vpop.f32.mrb[19].mxu0  ;;  %v2236_v6 = vsel %vm2198_vm2, %v3994_v43, -inf }
 0x1b5   :  { %v2232_v58 = vsel %vm2198_vm2, %v921_v56, -inf  ;;  %v414_v45 = vpop.trf.xlu0 }
 0x1b6   :  { %v2233_v62 = vmax.f32 %v2231_v54, %v2232_v58  ;;  %4100 = vmatmul.mubr.msk.bf16.gmra.mrb[124].mxu0 %vm431_vm1, %v4749_v47 }
 0x1b7   :  { %4103 = vmatprep.mubr.msk.bf16.mxu0 %vm431_vm1, %v4756_v49  ;;  %4212 = vmatmul.mubr.msk.bf16.gmra.mrb[64].mxu1 %vm431_vm1, %v414_v45 }
 0x1b8   :  { %v2235_v2 = vmax.f32 %v2233_v62, %v2234_v0  ;;  %4215 = vmatprep.mubr.msk.bf16.mxu1 %vm431_vm1, %v423_v42 }
 0x1b9   :  { %v3997_v8 = vpop.f32.mrb[20].mxu0 }
 0x1ba   :  { %v934_v10 = vpop.f32.mrb[21].mxu0  ;;  %v2237_v35 = vmax.f32 %v2235_v2, %v2236_v6  ;;  %v2242_v20 = vsel %vm2198_vm2, %v3997_v8, -inf }
 0x1bb   :  { %v2238_v12 = vsel %vm2198_vm2, %v934_v10, -inf  ;;  %v3998_v14 = vpop.f32.mrb[22].mxu0 }
 0x1bc   :  { %v2239_v47 = vmax.f32 %v2237_v35, %v2238_v12  ;;  %v937_v37 = vpop.f32.mrb[23].mxu0  ;;  %v2244_v24 = vsel %vm2198_vm2, %v3998_v14, -inf }
 0x1bd   :  { %v2240_v49 = vsel %vm2198_vm2, %v937_v37, -inf }
 0x1be   :  { %v2241_v19 = vmax.f32 %v2239_v47, %v2240_v49  ;;  %4104 = vmatmul.mubr.msk.bf16.gmra.mrb[128].mxu0 %vm431_vm1, %v4759_v51 }
 0x1bf   :  { %4107 = vmatprep.mubr.msk.bf16.mxu0 %vm431_vm1, %v4766_v53  ;;  %4216 = vmatmul.mubr.msk.bf16.gmra.mrb[68].mxu1 %vm431_vm1, %v424_v60 }
 0x1c0   :  { %v2243_v22 = vmax.f32 %v2241_v19, %v2242_v20  ;;  %4219 = vmatprep.mubr.msk.bf16.mxu1 %vm431_vm1, %v425_v15 }
 0x1c1   :  { %v4001_v3 = vpop.f32.mrb[24].mxu0 }
 0x1c2   :  { %v950_v29 = vpop.f32.mrb[25].mxu0  ;;  %v2245_v30 = vmax.f32 %v2243_v22, %v2244_v24 }
 0x1c3   :  { %v1966_v51 = vsel %vm1934_vm3, %v950_v29, -inf  ;;  %v4002_v32 = vpop.f32.mrb[26].mxu0 }
 0x1c4   :  { %v2246_v39 = vsel %vm2198_vm2, %v1966_v51, -inf  ;;  %v953_v53 = vpop.f32.mrb[27].mxu0 }
 0x1c5   :  { %v4898_v34 = vmax.f32 %v2245_v30, %v2246_v39 }
 0x1c6   :  { %4108 = vmatmul.mubr.msk.bf16.gmra.mrb[132].mxu0 %vm431_vm1, %v4769_v55 }
 0x1c7   :  { %4111 = vmatprep.mubr.msk.bf16.mxu0 %vm431_vm1, %v4776_v57  ;;  %4220 = vmatmul.mubr.msk.bf16.gmra.mrb[72].mxu1 %vm431_vm1, %v426_v25 }
 0x1c8   :  { %4223 = vmatprep.mubr.msk.bf16.mxu1 %vm431_vm1, %v427_v36 }
 0x1c9   :  { %v4005_v38 = vpop.f32.mrb[28].mxu0 }
 0x1ca   :  { %v966_v41 = vpop.f32.mrb[29].mxu0 }
 0x1cb   :  { %v4006_v40 = vpop.f32.mrb[30].mxu0 }
 0x1cc   :  { %v969_v42 = vpop.f32.mrb[31].mxu0 }
 0x1ce   :  { %4112 = vmatmul.mubr.msk.bf16.gmra.mrb[136].mxu0 %vm431_vm1, %v4779_v59 }
 0x1cf   :  { %4115 = vmatprep.mubr.msk.bf16.mxu0 %vm431_vm1, %v4786_v61  ;;  %4224 = vmatmul.mubr.msk.bf16.gmra.mrb[76].mxu1 %vm431_vm1, %v428_v44 }
 0x1d1   :  { %v4009_v55 = vpop.f32.mrb[32].mxu0 }
 0x1d2   :  { %v982_v57 = vpop.f32.mrb[33].mxu0  ;;  %v2271_v33 = vsel %vm2198_vm2, %v4009_v55, -inf }
 0x1d3   :  { %v4010_v46 = vpop.f32.mrb[34].mxu0  ;;  %v2268_v48 = vsel %vm2198_vm2, %v982_v57, -inf  ;;  %v4529_v57 = vmov 0.0  }
 0x1d4   :  { %v985_v31 = vpop.f32.mrb[35].mxu0  ;;  %v2273_v61 = vsel %vm2198_vm2, %v4010_v46, -inf  ;;  %4231 = vmatprep.subr.bf16.mxu1 %v4529_v57  ;;  %v2262_v46 = vrot.slane %v4898_v34, 4 }
 0x1d5   :  { %v2269_v50 = vsel %vm2198_vm2, %v985_v31, -inf }
 0x1d6   :  { %v2270_v52 = vmax.f32 %v2268_v48, %v2269_v50  ;;  %4116 = vmatmul.mubr.msk.bf16.gmra.mrb[140].mxu0 %vm431_vm1, %v4789_v63  ;;  %v4382_v48 = vld [vmem:[%s5301_s2] sm:$0xff]  }
 0x1d7   :  { %4119 = vmatprep.mubr.msk.bf16.mxu0 %vm431_vm1, %v4796_v1  ;;  %4232 = vmatpush3.bf16.msra.mxu1 %v4382_v48 }
 0x1d8   :  { %v2272_v59 = vmax.f32 %v2270_v52, %v2271_v33  ;;  %4233 = vmatprep.subr.bf16.mxu1 %v4529_v57 }
 0x1d9   :  { %v4013_v43 = vpop.f32.mrb[36].mxu0 }
 0x1da   :  { %v998_v54 = vpop.f32.mrb[37].mxu0  ;;  %v2274_v56 = vmax.f32 %v2272_v59, %v2273_v61  ;;  %v2279_v63 = vsel %vm2198_vm2, %v4013_v43, -inf }
 0x1db   :  { %v2275_v58 = vsel %vm2198_vm2, %v998_v54, -inf  ;;  %v4014_v45 = vpop.f32.mrb[38].mxu0 }
 0x1dc   :  { %v2276_v60 = vmax.f32 %v2274_v56, %v2275_v58  ;;  %v1001_v62 = vpop.f32.mrb[39].mxu0  ;;  %v2281_v6 = vsel %vm2198_vm2, %v4014_v45, -inf }
 0x1dd   :  { %v2277_v0 = vsel %vm2198_vm2, %v1001_v62, -inf }
 0x1de   :  { %v2278_v2 = vmax.f32 %v2276_v60, %v2277_v0  ;;  %4120 = vmatmul.mubr.msk.bf16.gmra.mrb[144].mxu0 %vm431_vm1, %v4799_v4 }
 0x1df   :  { %4123 = vmatprep.mubr.msk.bf16.mxu0 %vm431_vm1, %v4806_v7 }
 0x1e0   :  { %v2280_v1 = vmax.f32 %v2278_v2, %v2279_v63 }
 0x1e1   :  { %v4017_v8 = vpop.f32.mrb[40].mxu0 }
 0x1e2   :  { %v1014_v10 = vpop.f32.mrb[41].mxu0  ;;  %v2282_v35 = vmax.f32 %v2280_v1, %v2281_v6  ;;  %v2287_v4 = vsel %vm2198_vm2, %v4017_v8, -inf }
 0x1e3   :  { %v2283_v12 = vsel %vm2198_vm2, %v1014_v10, -inf  ;;  %v4018_v14 = vpop.f32.mrb[42].mxu0 }
 0x1e4   :  { %v2284_v15 = vmax.f32 %v2282_v35, %v2283_v12  ;;  %v1017_v47 = vpop.f32.mrb[43].mxu0  ;;  %v2289_v19 = vsel %vm2198_vm2, %v4018_v14, -inf }
 0x1e5   :  { %v2285_v37 = vsel %vm2198_vm2, %v1017_v47, -inf }
 0x1e6   :  { %v2286_v49 = vmax.f32 %v2284_v15, %v2285_v37  ;;  %4124 = vmatmul.mubr.msk.bf16.gmra.mrb[148].mxu0 %vm431_vm1, %v4809_v9 }
 0x1e7   :  { %4127 = vmatprep.mubr.msk.bf16.mxu0 %vm431_vm1, %v4816_v11 }
 0x1e8   :  { %v2288_v7 = vmax.f32 %v2286_v49, %v2287_v4 }
 0x1e9   :  { %v4021_v20 = vpop.f32.mrb[44].mxu0 }
 0x1ea   :  { %v1030_v22 = vpop.f32.mrb[45].mxu0  ;;  %v2290_v24 = vmax.f32 %v2288_v7, %v2289_v19  ;;  %v2295_v9 = vsel %vm2198_vm2, %v4021_v20, -inf }
 0x1eb   :  { %v2291_v3 = vsel %vm2198_vm2, %v1030_v22, -inf  ;;  %v4022_v25 = vpop.f32.mrb[46].mxu0 }
 0x1ec   :  { %v2292_v29 = vmax.f32 %v2290_v24, %v2291_v3  ;;  %v1033_v30 = vpop.f32.mrb[47].mxu0  ;;  %v2297_v39 = vsel %vm2198_vm2, %v4022_v25, -inf }
 0x1ed   :  { %v2293_v51 = vsel %vm2198_vm2, %v1033_v30, -inf }
 0x1ee   :  { %v2294_v32 = vmax.f32 %v2292_v29, %v2293_v51  ;;  %4128 = vmatmul.mubr.msk.bf16.gmra.mrb[152].mxu0 %vm431_vm1, %v4819_v13 }
 0x1ef   :  { %4131 = vmatprep.mubr.msk.bf16.mxu0 %vm431_vm1, %v4826_v16 }
 0x1f0   :  { %v2296_v11 = vmax.f32 %v2294_v32, %v2295_v9 }
 0x1f1   :  { %v4025_v53 = vpop.f32.mrb[48].mxu0 }
 0x1f2   :  { %v1046_v36 = vpop.f32.mrb[49].mxu0  ;;  %v2298_v38 = vmax.f32 %v2296_v11, %v2297_v39  ;;  %v2303_v16 = vsel %vm2198_vm2, %v4025_v53, -inf }
 0x1f3   :  { %v2299_v41 = vsel %vm2198_vm2, %v1046_v36, -inf  ;;  %v4026_v40 = vpop.f32.mrb[50].mxu0 }
 0x1f4   :  { %v2300_v42 = vmax.f32 %v2298_v38, %v2299_v41  ;;  %v1049_v44 = vpop.f32.mrb[51].mxu0  ;;  %v2305_v50 = vsel %vm2198_vm2, %v4026_v40, -inf }
 0x1f5   :  { %v2301_v55 = vsel %vm2198_vm2, %v1049_v44, -inf }
 0x1f6   :  { %v2302_v13 = vmax.f32 %v2300_v42, %v2301_v55  ;;  %4132 = vmatmul.mubr.msk.bf16.gmra.mrb[156].mxu0 %vm431_vm1, %v4831_v27 }
 0x1f7   :  { %4135 = vmatprep.mubr.msk.bf16.mxu0 %vm431_vm1, %v4686_v18  ;;  %v2263_v18 = vmax.f32 %v4898_v34, %v2262_v46 }
 0x1f8   :  { %v2304_v31 = vmax.f32 %v2302_v13, %v2303_v16 }
 0x1f9   :  { %v4029_v52 = vpop.f32.mrb[52].mxu0  ;;  %v2264_v60 = vrot.slane %v2263_v18, 2 }
 0x1fa   :  { %v1062_v33 = vpop.f32.mrb[53].mxu0  ;;  %v2306_v59 = vmax.f32 %v2304_v31, %v2305_v50  ;;  %v2311_v45 = vsel %vm2198_vm2, %v4029_v52, -inf }
 0x1fb   :  { %v2307_v27 = vsel %vm2198_vm2, %v1062_v33, -inf  ;;  %v4030_v61 = vpop.f32.mrb[54].mxu0  ;;  %v2265_v8 = vmax.f32 %v2263_v18, %v2264_v60 }
 0x1fc   :  { %v2308_v43 = vmax.f32 %v2306_v59, %v2307_v27  ;;  %v1065_v54 = vpop.f32.mrb[55].mxu0  ;;  %v2313_v0 = vsel %vm2198_vm2, %v4030_v61, -inf }
 0x1fd   :  { %v2309_v56 = vsel %vm2198_vm2, %v1065_v54, -inf  ;;  %v2266_v12 = vrot.slane %v2265_v8, 1 }
 0x1fe   :  { %v2310_v58 = vmax.f32 %v2308_v43, %v2309_v56  ;;  %4136 = vmatmul.mubr.msk.bf16.gmra.mrb[160].mxu0 %vm431_vm1, %v4692_v21 }
 0x1ff   :  { %4139 = vmatprep.mubr.msk.bf16.mxu0 %vm431_vm1, %v4696_v23  ;;  %v2267_v7 = vmax.f32 %v2265_v8, %v2266_v12 }
 0x200   :  { %v2312_v62 = vmax.f32 %v2310_v58, %v2311_v45 }
 0x201   :  { %v4033_v2 = vpop.f32.mrb[56].mxu0  ;;  %v2751_v32 = vpack.c.bf16 %v2267_v7, %v2267_v7 }
 0x202   :  { %v1078_v63 = vpop.f32.mrb[57].mxu0  ;;  %v2314_v34 = vmax.f32 %v2312_v62, %v2313_v0 }
 0x203   :  { %v1998_v1 = vsel %vm1934_vm3, %v1078_v63, -inf  ;;  %v4034_v6 = vpop.f32.mrb[58].mxu0  ;;  %v2778_v42 = vunpack.c.l.b16 %v2751_v32 }
 0x204   :  { %v2315_v10 = vsel %vm2198_vm2, %v1998_v1, -inf  ;;  %v1081_v21 = vpop.f32.mrb[59].mxu0 }
 0x205   :  { %v2316_v35 = vmax.f32 %v2314_v34, %v2315_v10 }
 0x206   :  { %4140 = vmatmul.mubr.msk.bf16.gmra.mrb[164].mxu0 %vm431_vm1, %v4702_v5 }
 0x207   :  { %v2331_v23 = vrot.slane %v2316_v35, 4  ;;  %4143 = vmatprep.mubr.msk.bf16.mxu0 %vm431_vm1, %v4706_v26 }
 0x209   :  { %v2332_v14 = vmax.f32 %v2316_v35, %v2331_v23  ;;  %v4037_v15 = vpop.f32.mrb[60].mxu0  ;;  %v4149_v4 = vpop.f32.mrb[0].mxu1 }
 0x20a   :  { %v1094_v47 = vpop.f32.mrb[61].mxu0  ;;  %v2571_v20 = vsel %vm2198_vm2, %v4149_v4, -inf  ;;  %v1542_v22 = vpop.f32.mrb[1].mxu1 }
 0x20b   :  { %v2333_v37 = vrot.slane %v2332_v14, 2  ;;  %v4038_v49 = vpop.f32.mrb[62].mxu0  ;;  %v2567_v3 = vsel %vm2198_vm2, %v1542_v22, -inf  ;;  %v4150_v5 = vpop.f32.mrb[2].mxu1 }
 0x20c   :  { %v1097_v19 = vpop.f32.mrb[63].mxu0  ;;  %v2568_v26 = vmax.f32 %v2571_v20, %v2567_v3  ;;  %v2573_v25 = vsel %vm2198_vm2, %v4150_v5, -inf  ;;  %v1545_v29 = vpop.f32.mrb[3].mxu1 }
 0x20d   :  { %v2334_v24 = vmax.f32 %v2332_v14, %v2333_v37  ;;  %v2569_v51 = vsel %vm2198_vm2, %v1545_v29, -inf }
 0x20e   :  { %4144 = vmatmul.mubr.msk.bf16.gmra.mrb[168].mxu0 %vm431_vm1, %v4712_v28  ;;  %v2570_v9 = vmax.f32 %v2568_v26, %v2573_v25 }
 0x20f   :  { %v2335_v30 = vrot.slane %v2334_v24, 1 }
 0x210   :  { %v2572_v36 = vmax.f32 %v2570_v9, %v2569_v51 }
 0x211   :  { %v2336_v11 = vmax.f32 %v2334_v24, %v2335_v30  ;;  %v4041_v39 = vpop.f32.mrb[64].mxu0  ;;  %v4153_v40 = vpop.f32.mrb[4].mxu1 }
 0x212   :  { %v1110_v53 = vpop.f32.mrb[65].mxu0  ;;  %v2579_v55 = vsel %vm2198_vm2, %v4153_v40, -inf  ;;  %v1558_v13 = vpop.f32.mrb[5].mxu1  ;;  %v2340_v61 = vsel %vm2198_vm2, %v4041_v39, -inf }
 0x213   :  { %v2752_v38 = vpack.c.bf16 %v2336_v11, %v2336_v11  ;;  %v4042_v41 = vpop.f32.mrb[66].mxu0  ;;  %v2337_v28 = vsel %vm2198_vm2, %v1110_v53, -inf  ;;  %v2574_v31 = vmax.f32 %v2572_v36, %v2579_v55  ;;  %v2575_v48 = vsel %vm2198_vm2, %v1558_v13, -inf  ;;  %v4154_v50 = vpop.f32.mrb[6].mxu1 }
 0x214   :  { %v1113_v44 = vpop.f32.mrb[67].mxu0  ;;  %v2581_v33 = vsel %vm2198_vm2, %v4154_v50, -inf  ;;  %v1561_v59 = vpop.f32.mrb[7].mxu1  ;;  %v2342_v56 = vsel %vm2198_vm2, %v4042_v41, -inf }
 0x215   :  { %v2779_v16 = vunpack.c.l.b16 %v2752_v38  ;;  %v2338_v46 = vsel %vm2198_vm2, %v1113_v44, -inf  ;;  %v2576_v18 = vmax.f32 %v2574_v31, %v2575_v48  ;;  %v2577_v54 = vsel %vm2198_vm2, %v1561_v59, -inf }
 0x216   :  { %v2339_v52 = vmax.f32 %v2337_v28, %v2338_v46 }
 0x217   :  { %v4984_v27 = vsel %vm2786_vm4, %v2779_v16, %v2778_v42  ;;  %v2578_v45 = vmax.f32 %v2576_v18, %v2581_v33 }
 0x218   :  { %v2341_v43 = vmax.f32 %v2339_v52, %v2340_v61 }
 0x219   :  { %v4045_v58 = vpop.f32.mrb[68].mxu0  ;;  %v2580_v63 = vmax.f32 %v2578_v45, %v2577_v54  ;;  %v4157_v34 = vpop.f32.mrb[8].mxu1 }
 0x21a   :  { %v1126_v60 = vpop.f32.mrb[69].mxu0  ;;  %v2343_v62 = vmax.f32 %v2341_v43, %v2342_v56  ;;  %v2587_v8 = vsel %vm2198_vm2, %v4157_v34, -inf  ;;  %v1574_v10 = vpop.f32.mrb[9].mxu1  ;;  %v2348_v37 = vsel %vm2198_vm2, %v4045_v58, -inf }
 0x21b   :  { %v2344_v0 = vsel %vm2198_vm2, %v1126_v60, -inf  ;;  %v4046_v2 = vpop.f32.mrb[70].mxu0  ;;  %v2582_v35 = vmax.f32 %v2580_v63, %v2587_v8  ;;  %v2583_v23 = vsel %vm2198_vm2, %v1574_v10, -inf  ;;  %v4158_v12 = vpop.f32.mrb[10].mxu1 }
 0x21c   :  { %v2345_v1 = vmax.f32 %v2343_v62, %v2344_v0  ;;  %v1129_v6 = vpop.f32.mrb[71].mxu0  ;;  %v2589_v15 = vsel %vm2198_vm2, %v4158_v12, -inf  ;;  %v1577_v47 = vpop.f32.mrb[11].mxu1  ;;  %v2350_v19 = vsel %vm2198_vm2, %v4046_v2, -inf }
 0x21d   :  { %v2346_v21 = vsel %vm2198_vm2, %v1129_v6, -inf  ;;  %v2584_v49 = vmax.f32 %v2582_v35, %v2583_v23  ;;  %v2585_v7 = vsel %vm2198_vm2, %v1577_v47, -inf }
 0x21e   :  { %v2347_v14 = vmax.f32 %v2345_v1, %v2346_v21 }
 0x21f   :  { %v2586_v22 = vmax.f32 %v2584_v49, %v2589_v15 }
 0x220   :  { %v2349_v4 = vmax.f32 %v2347_v14, %v2348_v37 }
 0x221   :  { %v4049_v20 = vpop.f32.mrb[72].mxu0  ;;  %v2588_v25 = vmax.f32 %v2586_v22, %v2585_v7  ;;  %v4161_v29 = vpop.f32.mrb[12].mxu1 }
 0x222   :  { %v1142_v24 = vpop.f32.mrb[73].mxu0  ;;  %v2351_v3 = vmax.f32 %v2349_v4, %v2350_v19  ;;  %v1590_v32 = vpop.f32.mrb[13].mxu1  ;;  %v2356_v41 = vsel %vm2198_vm2, %v4049_v20, -inf }
 0x223   :  { %v2352_v5 = vsel %vm2198_vm2, %v1142_v24, -inf  ;;  %v4050_v26 = vpop.f32.mrb[74].mxu0  ;;  %v2126_v11 = vsel %vm1934_vm3, %v1590_v32, -inf  ;;  %v4162_v39 = vpop.f32.mrb[14].mxu1 }
 0x224   :  { %v2353_v30 = vmax.f32 %v2351_v3, %v2352_v5  ;;  %v1145_v51 = vpop.f32.mrb[75].mxu0  ;;  %v2591_v36 = vsel %vm2198_vm2, %v2126_v11, -inf  ;;  %v1593_v38 = vpop.f32.mrb[15].mxu1  ;;  %v2358_v28 = vsel %vm2198_vm2, %v4050_v26, -inf }
 0x225   :  { %v2354_v9 = vsel %vm2198_vm2, %v1145_v51, -inf  ;;  %v5003_v40 = vmax.f32 %v2588_v25, %v2591_v36 }
 0x226   :  { %v2355_v53 = vmax.f32 %v2353_v30, %v2354_v9 }
 0x228   :  { %v2357_v42 = vmax.f32 %v2355_v53, %v2356_v41 }
 0x229   :  { %v4053_v44 = vpop.f32.mrb[76].mxu0  ;;  %v4165_v31 = vpop.f32.mrb[16].mxu1 }
 0x22a   :  { %v1158_v55 = vpop.f32.mrb[77].mxu0  ;;  %v2359_v13 = vmax.f32 %v2357_v42, %v2358_v28  ;;  %v1606_v52 = vpop.f32.mrb[17].mxu1  ;;  %v2364_v43 = vsel %vm2198_vm2, %v4053_v44, -inf }
 0x22b   :  { %v2360_v16 = vsel %vm2198_vm2, %v1158_v55, -inf  ;;  %v4054_v46 = vpop.f32.mrb[78].mxu0  ;;  %v4166_v59 = vpop.f32.mrb[18].mxu1 }
 0x22c   :  { %v2361_v48 = vmax.f32 %v2359_v13, %v2360_v16  ;;  %v1161_v50 = vpop.f32.mrb[79].mxu0  ;;  %v1609_v18 = vpop.f32.mrb[19].mxu1  ;;  %v2366_v56 = vsel %vm2198_vm2, %v4054_v46, -inf }
 0x22d   :  { %v2362_v33 = vsel %vm2198_vm2, %v1161_v50, -inf }
 0x22e   :  { %v2363_v61 = vmax.f32 %v2361_v48, %v2362_v33 }
 0x230   :  { %v2365_v54 = vmax.f32 %v2363_v61, %v2364_v43 }
 0x231   :  { %v4057_v58 = vpop.f32.mrb[80].mxu0  ;;  %v4169_v2 = vpop.f32.mrb[20].mxu1 }
 0x232   :  { %v1174_v45 = vpop.f32.mrb[81].mxu0  ;;  %v2367_v60 = vmax.f32 %v2365_v54, %v2366_v56  ;;  %v1622_v1 = vpop.f32.mrb[21].mxu1  ;;  %v2372_v23 = vsel %vm2198_vm2, %v4057_v58, -inf  ;;  %v2616_v12 = vsel %vm2198_vm2, %v4169_v2, -inf }
 0x233   :  { %v2368_v62 = vsel %vm2198_vm2, %v1174_v45, -inf  ;;  %v4058_v0 = vpop.f32.mrb[82].mxu0  ;;  %v2613_v8 = vsel %vm2198_vm2, %v1622_v1, -inf  ;;  %v4170_v10 = vpop.f32.mrb[22].mxu1 }
 0x234   :  { %v2369_v63 = vmax.f32 %v2367_v60, %v2368_v62  ;;  %v1177_v34 = vpop.f32.mrb[83].mxu0  ;;  %v1625_v35 = vpop.f32.mrb[23].mxu1  ;;  %v2374_v37 = vsel %vm2198_vm2, %v4058_v0, -inf  ;;  %v2618_v4 = vsel %vm2198_vm2, %v4170_v10, -inf }
 0x235   :  { %v2370_v6 = vsel %vm2198_vm2, %v1177_v34, -inf  ;;  %v2614_v14 = vsel %vm2198_vm2, %v1625_v35, -inf }
 0x236   :  { %v2371_v21 = vmax.f32 %v2369_v63, %v2370_v6  ;;  %v2615_v47 = vmax.f32 %v2613_v8, %v2614_v14 }
 0x238   :  { %v2373_v15 = vmax.f32 %v2371_v21, %v2372_v23  ;;  %v2617_v20 = vmax.f32 %v2615_v47, %v2616_v12 }
 0x239   :  { %v4061_v49 = vpop.f32.mrb[84].mxu0  ;;  %v4173_v3 = vpop.f32.mrb[24].mxu1 }
 0x23a   :  { %v1190_v7 = vpop.f32.mrb[85].mxu0  ;;  %v2375_v19 = vmax.f32 %v2373_v15, %v2374_v37  ;;  %v1638_v25 = vpop.f32.mrb[25].mxu1  ;;  %v2619_v29 = vmax.f32 %v2617_v20, %v2618_v4  ;;  %v2380_v53 = vsel %vm2198_vm2, %v4061_v49, -inf  ;;  %v2624_v36 = vsel %vm2198_vm2, %v4173_v3, -inf }
 0x23b   :  { %v2376_v22 = vsel %vm2198_vm2, %v1190_v7, -inf  ;;  %v4062_v24 = vpop.f32.mrb[86].mxu0  ;;  %v2620_v51 = vsel %vm2198_vm2, %v1638_v25, -inf  ;;  %v4174_v32 = vpop.f32.mrb[26].mxu1 }
 0x23c   :  { %v2377_v5 = vmax.f32 %v2375_v19, %v2376_v22  ;;  %v1193_v26 = vpop.f32.mrb[87].mxu0  ;;  %v2621_v11 = vmax.f32 %v2619_v29, %v2620_v51  ;;  %v1641_v39 = vpop.f32.mrb[27].mxu1  ;;  %v2382_v28 = vsel %vm2198_vm2, %v4062_v24, -inf  ;;  %v2626_v55 = vsel %vm2198_vm2, %v4174_v32, -inf }
 0x23d   :  { %v2378_v30 = vsel %vm2198_vm2, %v1193_v26, -inf  ;;  %v2622_v38 = vsel %vm2198_vm2, %v1641_v39, -inf }
 0x23e   :  { %v2379_v9 = vmax.f32 %v2377_v5, %v2378_v30  ;;  %v2623_v42 = vmax.f32 %v2621_v11, %v2622_v38 }
 0x240   :  { %v2381_v41 = vmax.f32 %v2379_v9, %v2380_v53  ;;  %v2625_v46 = vmax.f32 %v2623_v42, %v2624_v36 }
 0x241   :  { %v4065_v44 = vpop.f32.mrb[88].mxu0  ;;  %v4177_v50 = vpop.f32.mrb[28].mxu1 }
 0x242   :  { %v1206_v13 = vpop.f32.mrb[89].mxu0  ;;  %v2383_v16 = vmax.f32 %v2381_v41, %v2382_v28  ;;  %v1654_v59 = vpop.f32.mrb[29].mxu1  ;;  %v2627_v61 = vmax.f32 %v2625_v46, %v2626_v55  ;;  %v2632_v60 = vsel %vm2198_vm2, %v4177_v50, -inf  ;;  %v4383_v46 = vld [vmem:[%s5301_s2 + $0x8] sm:$0xff]  }
 0x243   :  { %v2030_v31 = vsel %vm1934_vm3, %v1206_v13, -inf  ;;  %v4066_v48 = vpop.f32.mrb[90].mxu0  ;;  %v2628_v43 = vsel %vm2198_vm2, %v1654_v59, -inf  ;;  %v4178_v54 = vpop.f32.mrb[30].mxu1  ;;  %4234 = vmatpush3.bf16.msra.mxu1 %v4383_v46 }
 0x244   :  { %v2384_v52 = vsel %vm2198_vm2, %v2030_v31, -inf  ;;  %v1209_v33 = vpop.f32.mrb[91].mxu0  ;;  %v2629_v56 = vmax.f32 %v2627_v61, %v2628_v43  ;;  %v1657_v58 = vpop.f32.mrb[31].mxu1  ;;  %v2634_v34 = vsel %vm2198_vm2, %v4178_v54, -inf }
 0x245   :  { %v2385_v18 = vmax.f32 %v2383_v16, %v2384_v52  ;;  %v2630_v62 = vsel %vm2198_vm2, %v1657_v58, -inf }
 0x246   :  { %v2631_v0 = vmax.f32 %v2629_v56, %v2630_v62 }
 0x247   :  { %v2400_v45 = vrot.slane %v2385_v18, 4 }
 0x248   :  { %v2633_v6 = vmax.f32 %v2631_v0, %v2632_v60 }
 0x249   :  { %v2401_v2 = vmax.f32 %v2385_v18, %v2400_v45  ;;  %v4069_v63 = vpop.f32.mrb[92].mxu0  ;;  %v4181_v21 = vpop.f32.mrb[32].mxu1 }
 0x24a   :  { %v1222_v1 = vpop.f32.mrb[93].mxu0  ;;  %v1670_v23 = vpop.f32.mrb[33].mxu1  ;;  %v2635_v12 = vmax.f32 %v2633_v6, %v2634_v34  ;;  %v2640_v7 = vsel %vm2198_vm2, %v4181_v21, -inf }
 0x24b   :  { %v2402_v8 = vrot.slane %v2401_v2, 2  ;;  %v4070_v10 = vpop.f32.mrb[94].mxu0  ;;  %v2636_v15 = vsel %vm2198_vm2, %v1670_v23, -inf  ;;  %v4182_v47 = vpop.f32.mrb[34].mxu1 }
 0x24c   :  { %v1225_v35 = vpop.f32.mrb[95].mxu0  ;;  %v2637_v37 = vmax.f32 %v2635_v12, %v2636_v15  ;;  %v1673_v49 = vpop.f32.mrb[35].mxu1  ;;  %v2642_v3 = vsel %vm2198_vm2, %v4182_v47, -inf }
 0x24d   :  { %v2403_v14 = vmax.f32 %v2401_v2, %v2402_v8  ;;  %v2638_v19 = vsel %vm2198_vm2, %v1673_v49, -inf }
 0x24e   :  { %v2639_v20 = vmax.f32 %v2637_v37, %v2638_v19 }
 0x24f   :  { %v2404_v4 = vrot.slane %v2403_v14, 1 }
 0x250   :  { %v2641_v26 = vmax.f32 %v2639_v20, %v2640_v7 }
 0x251   :  { %v2405_v22 = vmax.f32 %v2403_v14, %v2404_v4  ;;  %v4073_v24 = vpop.f32.mrb[96].mxu0  ;;  %v4185_v30 = vpop.f32.mrb[36].mxu1 }
 0x252   :  { %v1238_v5 = vpop.f32.mrb[97].mxu0  ;;  %v1686_v32 = vpop.f32.mrb[37].mxu1  ;;  %v2643_v9 = vmax.f32 %v2641_v26, %v2642_v3  ;;  %v2409_v55 = vsel %vm2198_vm2, %v4073_v24, -inf  ;;  %v2648_v13 = vsel %vm2198_vm2, %v4185_v30, -inf }
 0x253   :  { %v2753_v25 = vpack.c.bf16 %v2405_v22, %v2405_v22  ;;  %v4074_v29 = vpop.f32.mrb[98].mxu0  ;;  %v2406_v39 = vsel %vm2198_vm2, %v1238_v5, -inf  ;;  %v2644_v36 = vsel %vm2198_vm2, %v1686_v32, -inf  ;;  %v4186_v38 = vpop.f32.mrb[38].mxu1 }
 0x254   :  { %v1241_v51 = vpop.f32.mrb[99].mxu0  ;;  %v2645_v42 = vmax.f32 %v2643_v9, %v2644_v36  ;;  %v1689_v28 = vpop.f32.mrb[39].mxu1  ;;  %v2411_v50 = vsel %vm2198_vm2, %v4074_v29, -inf  ;;  %v2650_v33 = vsel %vm2198_vm2, %v4186_v38, -inf }
 0x255   :  { %v2780_v11 = vunpack.c.l.b16 %v2753_v25  ;;  %v2407_v53 = vsel %vm2198_vm2, %v1241_v51, -inf  ;;  %v2646_v16 = vsel %vm2198_vm2, %v1689_v28, -inf }
 0x256   :  { %v2408_v41 = vmax.f32 %v2406_v39, %v2407_v53  ;;  %v2647_v48 = vmax.f32 %v2645_v42, %v2646_v16 }
 0x257   :  { %v5041_v44 = vsel %vm2788_vm5, %v2780_v11, %v4984_v27 }
 0x258   :  { %v2410_v31 = vmax.f32 %v2408_v41, %v2409_v55  ;;  %v2649_v61 = vmax.f32 %v2647_v48, %v2648_v13 }
 0x259   :  { %v4077_v52 = vpop.f32.mrb[100].mxu0  ;;  %v4189_v54 = vpop.f32.mrb[40].mxu1 }
 0x25a   :  { %v1254_v27 = vpop.f32.mrb[101].mxu0  ;;  %v2412_v59 = vmax.f32 %v2410_v31, %v2411_v50  ;;  %v1702_v45 = vpop.f32.mrb[41].mxu1  ;;  %v2651_v60 = vmax.f32 %v2649_v61, %v2650_v33  ;;  %v2417_v6 = vsel %vm2198_vm2, %v4077_v52, -inf  ;;  %v2656_v8 = vsel %vm2198_vm2, %v4189_v54, -inf }
 0x25b   :  { %v2413_v18 = vsel %vm2198_vm2, %v1254_v27, -inf  ;;  %v4078_v43 = vpop.f32.mrb[102].mxu0  ;;  %v2652_v0 = vsel %vm2198_vm2, %v1702_v45, -inf  ;;  %v4190_v2 = vpop.f32.mrb[42].mxu1 }
 0x25c   :  { %v2414_v56 = vmax.f32 %v2412_v59, %v2413_v18  ;;  %v1257_v58 = vpop.f32.mrb[103].mxu0  ;;  %v2653_v34 = vmax.f32 %v2651_v60, %v2652_v0  ;;  %v1705_v1 = vpop.f32.mrb[43].mxu1  ;;  %v2419_v23 = vsel %vm2198_vm2, %v4078_v43, -inf  ;;  %v2658_v14 = vsel %vm2198_vm2, %v4190_v2, -inf }
 0x25d   :  { %v2415_v62 = vsel %vm2198_vm2, %v1257_v58, -inf  ;;  %v2654_v10 = vsel %vm2198_vm2, %v1705_v1, -inf  ;;  %v429_v2 = vpop.trf.xlu1 }
 0x25e   :  { %v2416_v63 = vmax.f32 %v2414_v56, %v2415_v62  ;;  %v2655_v35 = vmax.f32 %v2653_v34, %v2654_v10  ;;  %4227 = vmatprep.mubr.msk.bf16.mxu1 %vm431_vm1, %v429_v2 }
 0x260   :  { %v2418_v21 = vmax.f32 %v2416_v63, %v2417_v6  ;;  %v2657_v37 = vmax.f32 %v2655_v35, %v2656_v8 }
 0x261   :  { %v4081_v12 = vpop.f32.mrb[104].mxu0  ;;  %v4193_v7 = vpop.f32.mrb[44].mxu1 }
 0x262   :  { %v1270_v15 = vpop.f32.mrb[105].mxu0  ;;  %v2420_v47 = vmax.f32 %v2418_v21, %v2419_v23  ;;  %v1718_v22 = vpop.f32.mrb[45].mxu1  ;;  %v2659_v24 = vmax.f32 %v2657_v37, %v2658_v14  ;;  %v2425_v51 = vsel %vm2198_vm2, %v4081_v12, -inf }
 0x263   :  { %v2421_v49 = vsel %vm2198_vm2, %v1270_v15, -inf  ;;  %v4082_v4 = vpop.f32.mrb[106].mxu0  ;;  %v2158_v5 = vsel %vm1934_vm3, %v1718_v22, -inf  ;;  %v4194_v26 = vpop.f32.mrb[46].mxu1 }
 0x264   :  { %v2422_v19 = vmax.f32 %v2420_v47, %v2421_v49  ;;  %v1273_v20 = vpop.f32.mrb[107].mxu0  ;;  %v2660_v29 = vsel %vm2198_vm2, %v2158_v5, -inf  ;;  %v1721_v30 = vpop.f32.mrb[47].mxu1  ;;  %v2427_v11 = vsel %vm2198_vm2, %v4082_v4, -inf }
 0x265   :  { %v2423_v3 = vsel %vm2198_vm2, %v1273_v20, -inf  ;;  %v5065_v32 = vmax.f32 %v2659_v24, %v2660_v29  ;;  %v430_v14 = vpop.trf.xlu1 }
 0x266   :  { %v2424_v25 = vmax.f32 %v2422_v19, %v2423_v3  ;;  %4228 = vmatmul.mubr.msk.bf16.gmra.mrb[80].mxu1 %vm431_vm1, %v430_v14 }
 0x267   :  { %4235 = vmatprep.mubr.msk.bf16.mxu1 %vm4530_vm6, %v4529_v57 }
 0x268   :  { %v2426_v9 = vmax.f32 %v2424_v25, %v2425_v51 }
 0x269   :  { %v4085_v39 = vpop.f32.mrb[108].mxu0 }
 0x26a   :  { %v1286_v53 = vpop.f32.mrb[109].mxu0  ;;  %v2428_v36 = vmax.f32 %v2426_v9, %v2427_v11  ;;  %v4197_v42 = vpop.f32.mrb[48].mxu1  ;;  %v2433_v50 = vsel %vm2198_vm2, %v4085_v39, -inf }
 0x26b   :  { %v2429_v38 = vsel %vm2198_vm2, %v1286_v53, -inf  ;;  %v4086_v41 = vpop.f32.mrb[110].mxu0  ;;  %v1734_v13 = vpop.f32.mrb[49].mxu1  ;;  %v5090_v42 = vld [vmem:[#allocation7] sm:$0xff]  }
 0x26c   :  { %v2430_v28 = vmax.f32 %v2428_v36, %v2429_v38  ;;  %v1289_v55 = vpop.f32.mrb[111].mxu0  ;;  %v4198_v46 = vpop.f32.mrb[50].mxu1  ;;  %v2435_v33 = vsel %vm2198_vm2, %v4086_v41, -inf  ;;  %4239 = vmatprep.subr.bf16.mxu1 %v5090_v42 }
 0x26d   :  { %v2431_v16 = vsel %vm2198_vm2, %v1289_v55, -inf  ;;  %v1737_v48 = vpop.f32.mrb[51].mxu1 }
 0x26e   :  { %v2432_v31 = vmax.f32 %v2430_v28, %v2431_v16 }
 0x270   :  { %v2434_v52 = vmax.f32 %v2432_v31, %v2433_v50 }
 0x271   :  { %v4089_v27 = vpop.f32.mrb[112].mxu0 }
 0x272   :  { %v1302_v59 = vpop.f32.mrb[113].mxu0  ;;  %v2436_v61 = vmax.f32 %v2434_v52, %v2435_v33  ;;  %v4201_v54 = vpop.f32.mrb[52].mxu1  ;;  %v2441_v1 = vsel %vm2198_vm2, %v4089_v27, -inf }
 0x273   :  { %v2437_v18 = vsel %vm2198_vm2, %v1302_v59, -inf  ;;  %v4090_v43 = vpop.f32.mrb[114].mxu0  ;;  %v1750_v45 = vpop.f32.mrb[53].mxu1  ;;  %v2685_v6 = vsel %vm2198_vm2, %v4201_v54, -inf }
 0x274   :  { %v2438_v56 = vmax.f32 %v2436_v61, %v2437_v18  ;;  %v1305_v58 = vpop.f32.mrb[115].mxu0  ;;  %v2682_v62 = vsel %vm2198_vm2, %v1750_v45, -inf  ;;  %v4202_v0 = vpop.f32.mrb[54].mxu1  ;;  %v2443_v35 = vsel %vm2198_vm2, %v4090_v43, -inf }
 0x275   :  { %v2439_v60 = vsel %vm2198_vm2, %v1305_v58, -inf  ;;  %v1753_v34 = vpop.f32.mrb[55].mxu1  ;;  %v2687_v12 = vsel %vm2198_vm2, %v4202_v0, -inf }
 0x276   :  { %v2440_v63 = vmax.f32 %v2438_v56, %v2439_v60  ;;  %v2683_v8 = vsel %vm2198_vm2, %v1753_v34, -inf }
 0x277   :  { %v2684_v21 = vmax.f32 %v2682_v62, %v2683_v8 }
 0x278   :  { %v2442_v10 = vmax.f32 %v2440_v63, %v2441_v1 }
 0x279   :  { %v4093_v23 = vpop.f32.mrb[116].mxu0  ;;  %v2686_v37 = vmax.f32 %v2684_v21, %v2685_v6 }
 0x27a   :  { %v1318_v15 = vpop.f32.mrb[117].mxu0  ;;  %v2444_v47 = vmax.f32 %v2442_v10, %v2443_v35  ;;  %v4205_v7 = vpop.f32.mrb[56].mxu1  ;;  %v2449_v51 = vsel %vm2198_vm2, %v4093_v23, -inf }
 0x27b   :  { %v2445_v49 = vsel %vm2198_vm2, %v1318_v15, -inf  ;;  %v4094_v4 = vpop.f32.mrb[118].mxu0  ;;  %v1766_v22 = vpop.f32.mrb[57].mxu1  ;;  %v2688_v24 = vmax.f32 %v2686_v37, %v2687_v12  ;;  %v2693_v9 = vsel %vm2198_vm2, %v4205_v7, -inf }
 0x27c   :  { %v2446_v19 = vmax.f32 %v2444_v47, %v2445_v49  ;;  %v1321_v20 = vpop.f32.mrb[119].mxu0  ;;  %v2689_v5 = vsel %vm2198_vm2, %v1766_v22, -inf  ;;  %v4206_v26 = vpop.f32.mrb[58].mxu1  ;;  %v2451_v36 = vsel %vm2198_vm2, %v4094_v4, -inf }
 0x27d   :  { %v2447_v3 = vsel %vm2198_vm2, %v1321_v20, -inf  ;;  %v2690_v29 = vmax.f32 %v2688_v24, %v2689_v5  ;;  %v1769_v30 = vpop.f32.mrb[59].mxu1  ;;  %v2695_v41 = vsel %vm2198_vm2, %v4206_v26, -inf }
 0x27e   :  { %v2448_v25 = vmax.f32 %v2446_v19, %v2447_v3  ;;  %v2691_v11 = vsel %vm2198_vm2, %v1769_v30, -inf }
 0x27f   :  { %v2692_v53 = vmax.f32 %v2690_v29, %v2691_v11 }
 0x280   :  { %v2450_v39 = vmax.f32 %v2448_v25, %v2449_v51 }
 0x281   :  { %v4097_v38 = vpop.f32.mrb[120].mxu0  ;;  %v2694_v13 = vmax.f32 %v2692_v53, %v2693_v9 }
 0x282   :  { %v1334_v28 = vpop.f32.mrb[121].mxu0  ;;  %v2452_v55 = vmax.f32 %v2450_v39, %v2451_v36  ;;  %v4209_v31 = vpop.f32.mrb[60].mxu1 }
 0x283   :  { %v2062_v16 = vsel %vm1934_vm3, %v1334_v28, -inf  ;;  %v4098_v46 = vpop.f32.mrb[122].mxu0  ;;  %v1782_v52 = vpop.f32.mrb[61].mxu1  ;;  %v2696_v33 = vmax.f32 %v2694_v13, %v2695_v41  ;;  %v2701_v56 = vsel %vm2198_vm2, %v4209_v31, -inf }
 0x284   :  { %v2453_v48 = vsel %vm2198_vm2, %v2062_v16, -inf  ;;  %v1337_v50 = vpop.f32.mrb[123].mxu0  ;;  %v2697_v59 = vsel %vm2198_vm2, %v1782_v52, -inf  ;;  %v4210_v61 = vpop.f32.mrb[62].mxu1 }
 0x285   :  { %v2454_v27 = vmax.f32 %v2452_v55, %v2453_v48  ;;  %v2698_v18 = vmax.f32 %v2696_v33, %v2697_v59  ;;  %v1785_v43 = vpop.f32.mrb[63].mxu1  ;;  %v2703_v0 = vsel %vm2198_vm2, %v4210_v61, -inf }
 0x286   :  { %v2699_v58 = vsel %vm2198_vm2, %v1785_v43, -inf }
 0x287   :  { %v2469_v54 = vrot.slane %v2454_v27, 4  ;;  %v2700_v45 = vmax.f32 %v2698_v18, %v2699_v58 }
 0x289   :  { %v2470_v60 = vmax.f32 %v2454_v27, %v2469_v54  ;;  %v4101_v62 = vpop.f32.mrb[124].mxu0  ;;  %v2702_v63 = vmax.f32 %v2700_v45, %v2701_v56 }
 0x28a   :  { %v1350_v2 = vpop.f32.mrb[125].mxu0  ;;  %v4213_v6 = vpop.f32.mrb[64].mxu1 }
 0x28b   :  { %v2471_v34 = vrot.slane %v2470_v60, 2  ;;  %v4102_v1 = vpop.f32.mrb[126].mxu0  ;;  %v1798_v10 = vpop.f32.mrb[65].mxu1  ;;  %v2704_v21 = vmax.f32 %v2702_v63, %v2703_v0  ;;  %v2709_v37 = vsel %vm2198_vm2, %v4213_v6, -inf }
 0x28c   :  { %v1353_v8 = vpop.f32.mrb[127].mxu0  ;;  %v2705_v23 = vsel %vm2198_vm2, %v1798_v10, -inf  ;;  %v4214_v12 = vpop.f32.mrb[66].mxu1 }
 0x28d   :  { %v2472_v35 = vmax.f32 %v2470_v60, %v2471_v34  ;;  %v2706_v14 = vmax.f32 %v2704_v21, %v2705_v23  ;;  %v1801_v15 = vpop.f32.mrb[67].mxu1  ;;  %v2711_v20 = vsel %vm2198_vm2, %v4214_v12, -inf }
 0x28e   :  { %v2707_v49 = vsel %vm2198_vm2, %v1801_v15, -inf }
 0x28f   :  { %v2473_v47 = vrot.slane %v2472_v35, 1  ;;  %v2708_v4 = vmax.f32 %v2706_v14, %v2707_v49 }
 0x291   :  { %v2474_v7 = vmax.f32 %v2472_v35, %v2473_v47  ;;  %v4105_v19 = vpop.f32.mrb[128].mxu0  ;;  %v2710_v24 = vmax.f32 %v2708_v4, %v2709_v37 }
 0x292   :  { %v1366_v22 = vpop.f32.mrb[129].mxu0  ;;  %v4217_v26 = vpop.f32.mrb[68].mxu1  ;;  %v2478_v55 = vsel %vm2198_vm2, %v4105_v19, -inf }
 0x293   :  { %v2754_v3 = vpack.c.bf16 %v2474_v7, %v2474_v7  ;;  %v4106_v5 = vpop.f32.mrb[130].mxu0  ;;  %v1814_v29 = vpop.f32.mrb[69].mxu1  ;;  %v2712_v30 = vmax.f32 %v2710_v24, %v2711_v20  ;;  %v2475_v9 = vsel %vm2198_vm2, %v1366_v22, -inf  ;;  %v2717_v13 = vsel %vm2198_vm2, %v4217_v26, -inf }
 0x294   :  { %v1369_v25 = vpop.f32.mrb[131].mxu0  ;;  %v2713_v39 = vsel %vm2198_vm2, %v1814_v29, -inf  ;;  %v4218_v53 = vpop.f32.mrb[70].mxu1  ;;  %v2480_v48 = vsel %vm2198_vm2, %v4106_v5, -inf }
 0x295   :  { %v2781_v51 = vunpack.c.l.b16 %v2754_v3  ;;  %v2476_v11 = vsel %vm2198_vm2, %v1369_v25, -inf  ;;  %v2714_v38 = vmax.f32 %v2712_v30, %v2713_v39  ;;  %v1817_v41 = vpop.f32.mrb[71].mxu1  ;;  %v2719_v52 = vsel %vm2198_vm2, %v4218_v53, -inf }
 0x296   :  { %v2477_v36 = vmax.f32 %v2475_v9, %v2476_v11  ;;  %v2715_v16 = vsel %vm2198_vm2, %v1817_v41, -inf }
 0x297   :  { %v5110_v28 = vsel %vm2790_vm7, %v2781_v51, %v5041_v44  ;;  %v2716_v31 = vmax.f32 %v2714_v38, %v2715_v16 }
 0x298   :  { %v2479_v46 = vmax.f32 %v2477_v36, %v2478_v55 }
 0x299   :  { %v4109_v50 = vpop.f32.mrb[132].mxu0  ;;  %v2718_v59 = vmax.f32 %v2716_v31, %v2717_v13 }
 0x29a   :  { %v1382_v33 = vpop.f32.mrb[133].mxu0  ;;  %v2481_v27 = vmax.f32 %v2479_v46, %v2480_v48  ;;  %v4221_v18 = vpop.f32.mrb[72].mxu1  ;;  %v2486_v34 = vsel %vm2198_vm2, %v4109_v50, -inf }
 0x29b   :  { %v2482_v61 = vsel %vm2198_vm2, %v1382_v33, -inf  ;;  %v4110_v44 = vpop.f32.mrb[134].mxu0  ;;  %v1830_v56 = vpop.f32.mrb[73].mxu1  ;;  %v2720_v58 = vmax.f32 %v2718_v59, %v2719_v52  ;;  %v2725_v1 = vsel %vm2198_vm2, %v4221_v18, -inf }
 0x29c   :  { %v2483_v43 = vmax.f32 %v2481_v27, %v2482_v61  ;;  %v1385_v54 = vpop.f32.mrb[135].mxu0  ;;  %v2721_v60 = vsel %vm2198_vm2, %v1830_v56, -inf  ;;  %v4222_v62 = vpop.f32.mrb[74].mxu1  ;;  %v2488_v21 = vsel %vm2198_vm2, %v4110_v44, -inf }
 0x29d   :  { %v2484_v45 = vsel %vm2198_vm2, %v1385_v54, -inf  ;;  %v2722_v2 = vmax.f32 %v2720_v58, %v2721_v60  ;;  %v1833_v63 = vpop.f32.mrb[75].mxu1  ;;  %v2727_v23 = vsel %vm2198_vm2, %v4222_v62, -inf }
 0x29e   :  { %v2485_v0 = vmax.f32 %v2483_v43, %v2484_v45  ;;  %v2723_v6 = vsel %vm2198_vm2, %v1833_v63, -inf }
 0x29f   :  { %v2724_v10 = vmax.f32 %v2722_v2, %v2723_v6 }
 0x2a0   :  { %v2487_v8 = vmax.f32 %v2485_v0, %v2486_v34 }
 0x2a1   :  { %v4113_v35 = vpop.f32.mrb[136].mxu0  ;;  %v2726_v15 = vmax.f32 %v2724_v10, %v2725_v1 }
 0x2a2   :  { %v1398_v12 = vpop.f32.mrb[137].mxu0  ;;  %v2489_v14 = vmax.f32 %v2487_v8, %v2488_v21  ;;  %v4225_v49 = vpop.f32.mrb[76].mxu1  ;;  %v2494_v29 = vsel %vm2198_vm2, %v4113_v35, -inf }
 0x2a3   :  { %v2490_v47 = vsel %vm2198_vm2, %v1398_v12, -inf  ;;  %v4114_v37 = vpop.f32.mrb[138].mxu0  ;;  %v1846_v19 = vpop.f32.mrb[77].mxu1  ;;  %v2728_v20 = vmax.f32 %v2726_v15, %v2727_v23 }
 0x2a4   :  { %v2491_v4 = vmax.f32 %v2489_v14, %v2490_v47  ;;  %v1401_v7 = vpop.f32.mrb[139].mxu0  ;;  %v2190_v24 = vsel %vm1934_vm3, %v1846_v19, -inf  ;;  %v4226_v3 = vpop.f32.mrb[78].mxu1  ;;  %v2496_v9 = vsel %vm2198_vm2, %v4114_v37, -inf }
 0x2a5   :  { %v2492_v22 = vsel %vm2198_vm2, %v1401_v7, -inf  ;;  %v2729_v26 = vsel %vm2198_vm2, %v2190_v24, -inf  ;;  %v1849_v25 = vpop.f32.mrb[79].mxu1 }
 0x2a6   :  { %v2493_v5 = vmax.f32 %v2491_v4, %v2492_v22  ;;  %v5131_v30 = vmax.f32 %v2728_v20, %v2729_v26 }
 0x2a8   :  { %v2495_v51 = vmax.f32 %v2493_v5, %v2494_v29 }
 0x2a9   :  { %v4117_v11 = vpop.f32.mrb[140].mxu0 }
 0x2aa   :  { %v1414_v39 = vpop.f32.mrb[141].mxu0  ;;  %v2497_v53 = vmax.f32 %v2495_v51, %v2496_v9  ;;  %v2502_v46 = vsel %vm2198_vm2, %v4117_v11, -inf }
 0x2ab   :  { %v2498_v36 = vsel %vm2198_vm2, %v1414_v39, -inf  ;;  %v4118_v38 = vpop.f32.mrb[142].mxu0 }
 0x2ac   :  { %v2499_v41 = vmax.f32 %v2497_v53, %v2498_v36  ;;  %v1417_v55 = vpop.f32.mrb[143].mxu0  ;;  %v2504_v48 = vsel %vm2198_vm2, %v4118_v38, -inf }
 0x2ad   :  { %v2500_v13 = vsel %vm2198_vm2, %v1417_v55, -inf }
 0x2ae   :  { %v2501_v16 = vmax.f32 %v2499_v41, %v2500_v13 }
 0x2b0   :  { %v2503_v31 = vmax.f32 %v2501_v16, %v2502_v46 }
 0x2b1   :  { %v4121_v50 = vpop.f32.mrb[144].mxu0 }
 0x2b2   :  { %v1430_v52 = vpop.f32.mrb[145].mxu0  ;;  %v2505_v33 = vmax.f32 %v2503_v31, %v2504_v48  ;;  %v2510_v54 = vsel %vm2198_vm2, %v4121_v50, -inf }
 0x2b3   :  { %v2506_v27 = vsel %vm2198_vm2, %v1430_v52, -inf  ;;  %v4122_v59 = vpop.f32.mrb[146].mxu0 }
 0x2b4   :  { %v2507_v61 = vmax.f32 %v2505_v33, %v2506_v27  ;;  %v1433_v44 = vpop.f32.mrb[147].mxu0  ;;  %v2512_v58 = vsel %vm2198_vm2, %v4122_v59, -inf }
 0x2b5   :  { %v2508_v18 = vsel %vm2198_vm2, %v1433_v44, -inf }
 0x2b6   :  { %v2509_v43 = vmax.f32 %v2507_v61, %v2508_v18 }
 0x2b8   :  { %v2511_v56 = vmax.f32 %v2509_v43, %v2510_v54 }
 0x2b9   :  { %v4125_v45 = vpop.f32.mrb[148].mxu0 }
 0x2ba   :  { %v1446_v60 = vpop.f32.mrb[149].mxu0  ;;  %v2513_v62 = vmax.f32 %v2511_v56, %v2512_v58  ;;  %v2518_v8 = vsel %vm2198_vm2, %v4125_v45, -inf  ;;  %v2745_v45 = vrot.slane %v5131_v30, 4 }
 0x2bb   :  { %v2514_v0 = vsel %vm2198_vm2, %v1446_v60, -inf  ;;  %v4126_v2 = vpop.f32.mrb[150].mxu0 }
 0x2bc   :  { %v2515_v63 = vmax.f32 %v2513_v62, %v2514_v0  ;;  %v1449_v34 = vpop.f32.mrb[151].mxu0  ;;  %v2520_v21 = vsel %vm2198_vm2, %v4126_v2, -inf }
 0x2bd   :  { %v2516_v1 = vsel %vm2198_vm2, %v1449_v34, -inf }
 0x2be   :  { %v2517_v6 = vmax.f32 %v2515_v63, %v2516_v1 }
 0x2c0   :  { %v2519_v10 = vmax.f32 %v2517_v6, %v2518_v8  ;;  %v2746_v6 = vmax.f32 %v5131_v30, %v2745_v45 }
 0x2c1   :  { %v4129_v35 = vpop.f32.mrb[152].mxu0 }
 0x2c2   :  { %v1462_v23 = vpop.f32.mrb[153].mxu0  ;;  %v2521_v12 = vmax.f32 %v2519_v10, %v2520_v21 }
 0x2c3   :  { %v2094_v14 = vsel %vm1934_vm3, %v1462_v23, -inf  ;;  %v4130_v15 = vpop.f32.mrb[154].mxu0 }
 0x2c4   :  { %v2522_v47 = vsel %vm2198_vm2, %v2094_v14, -inf  ;;  %v1465_v37 = vpop.f32.mrb[155].mxu0 }
 0x2c5   :  { %v2523_v49 = vmax.f32 %v2521_v12, %v2522_v47  ;;  %v2747_v12 = vrot.slane %v2746_v6, 2 }
 0x2c7   :  { %v2538_v4 = vrot.slane %v2523_v49, 4  ;;  %v2748_v37 = vmax.f32 %v2746_v6, %v2747_v12 }
 0x2c9   :  { %v2539_v7 = vmax.f32 %v2523_v49, %v2538_v4  ;;  %v4133_v19 = vpop.f32.mrb[156].mxu0 }
 0x2ca   :  { %v1478_v20 = vpop.f32.mrb[157].mxu0 }
 0x2cb   :  { %v2540_v22 = vrot.slane %v2539_v7, 2  ;;  %v4134_v24 = vpop.f32.mrb[158].mxu0 }
 0x2cc   :  { %v1481_v3 = vpop.f32.mrb[159].mxu0 }
 0x2cd   :  { %v2541_v5 = vmax.f32 %v2539_v7, %v2540_v22  ;;  %v2749_v7 = vrot.slane %v2748_v37, 1 }
 0x2cf   :  { %v2542_v26 = vrot.slane %v2541_v5, 1  ;;  %v2750_v22 = vmax.f32 %v2748_v37, %v2749_v7  ;;  %v5212_v37 = vld [vmem:[%s5303_s4 + $0x8] sm:$0xff]   ;;  %v5229_v7 = vld [vmem:[%s5303_s4 + $0x20] sm:$0xff]  }
 0x2d1   :  { %v2543_v25 = vmax.f32 %v2541_v5, %v2542_v26  ;;  %v4137_v29 = vpop.f32.mrb[160].mxu0  ;;  %v2758_v26 = vpack.c.bf16 %v2750_v22, %v2750_v22 }
 0x2d2   :  { %v1494_v51 = vpop.f32.mrb[161].mxu0  ;;  %v2547_v55 = vsel %vm2198_vm2, %v4137_v29, -inf }
 0x2d3   :  { %v2755_v9 = vpack.c.bf16 %v2543_v25, %v2543_v25  ;;  %v4138_v17 = vpop.f32.mrb[162].mxu0  ;;  %v2544_v53 = vsel %vm2198_vm2, %v1494_v51, -inf }
 0x2d4   :  { %v1497_v11 = vpop.f32.mrb[163].mxu0  ;;  %v2549_v16 = vsel %vm2198_vm2, %v4138_v17, -inf }
 0x2d5   :  { %v2782_v39 = vunpack.c.l.b16 %v2755_v9  ;;  %v2545_v36 = vsel %vm2198_vm2, %v1497_v11, -inf  ;;  %v4386_v11 = vld [vmem:[%s5304_s5] sm:$0xff]  }
 0x2d6   :  { %v2546_v38 = vmax.f32 %v2544_v53, %v2545_v36  ;;  %v4385_v53 = vld [vmem:[#allocation7 + $0x8] sm:$0xff]  }
 0x2d7   :  { %v2793_v41 = vsel %vm2792_vm8, %v2782_v39, %v5110_v28  ;;  %v2676_v28 = vrot.slane %v5065_v32, 4  ;;  %v4387_v36 = vld [vmem:[%s5304_s5 + $0x8] sm:$0xff]  }
 0x2d8   :  { %v2548_v13 = vmax.f32 %v2546_v38, %v2547_v55  ;;  %v4388_v38 = vld [vmem:[%s5304_s5 + $0x10] sm:$0xff]   ;;  %v4391_v55 = vld [vmem:[%s5304_s5 + $0x28] sm:$0xff]  }
 0x2d9   :  { %v4141_v46 = vpop.f32.mrb[164].mxu0  ;;  %v2677_v63 = vmax.f32 %v5065_v32, %v2676_v28 }
 0x2da   :  { %v1510_v31 = vpop.f32.mrb[165].mxu0  ;;  %v2550_v48 = vmax.f32 %v2548_v13, %v2549_v16  ;;  %v2555_v44 = vsel %vm2198_vm2, %v4141_v46, -inf  ;;  %v4392_v13 = vld [vmem:[%s5304_s5 + $0x30] sm:$0xff]   ;;  %v4393_v16 = vld [vmem:[%s5304_s5 + $0x38] sm:$0xff]  }
 0x2db   :  { %v2551_v50 = vsel %vm2198_vm2, %v1510_v31, -inf  ;;  %v4142_v52 = vpop.f32.mrb[166].mxu0  ;;  %v2678_v21 = vrot.slane %v2677_v63, 2 }
 0x2dc   :  { %v2552_v33 = vmax.f32 %v2550_v48, %v2551_v50  ;;  %v1513_v27 = vpop.f32.mrb[167].mxu0  ;;  %v2557_v43 = vsel %vm2198_vm2, %v4142_v52, -inf  ;;  %v5204_v52 = vld [vmem:[%s5303_s4] sm:$0xff]  }
 0x2dd   :  { %v2553_v59 = vsel %vm2198_vm2, %v1513_v27, -inf  ;;  %v2679_v15 = vmax.f32 %v2677_v63, %v2678_v21 }
 0x2de   :  { %v2554_v61 = vmax.f32 %v2552_v33, %v2553_v59 }
 0x2df   :  { %v2680_v32 = vrot.slane %v2679_v15, 1 }
 0x2e0   :  { %v2556_v18 = vmax.f32 %v2554_v61, %v2555_v44 }
 0x2e1   :  { %v4145_v54 = vpop.f32.mrb[168].mxu0  ;;  %v2681_v20 = vmax.f32 %v2679_v15, %v2680_v32  ;;  %v4403_v32 = vld [vmem:[#allocation8 + $0x8] sm:$0xff]  }
 0x2e2   :  { %v1526_v56 = vpop.f32.mrb[169].mxu0  ;;  %v2558_v58 = vmax.f32 %v2556_v18, %v2557_v43  ;;  %v2563_v8 = vsel %vm2198_vm2, %v4145_v54, -inf }
 0x2e3   :  { %v2559_v60 = vsel %vm2198_vm2, %v1526_v56, -inf  ;;  %v4146_v62 = vpop.f32.mrb[170].mxu0  ;;  %v2757_v3 = vpack.c.bf16 %v2681_v20, %v2681_v20  ;;  %v5241_v20 = vld [vmem:[%s5303_s4 + $0x30] sm:$0xff]  }
 0x2e4   :  { %v2560_v0 = vmax.f32 %v2558_v58, %v2559_v60  ;;  %v1529_v2 = vpop.f32.mrb[171].mxu0  ;;  %v2565_v35 = vsel %vm2198_vm2, %v4146_v62, -inf }
 0x2e5   :  { %v2561_v34 = vsel %vm2198_vm2, %v1529_v2, -inf  ;;  %v2784_v29 = vunpack.c.l.b16 %v2757_v3 }
 0x2e6   :  { %v2562_v1 = vmax.f32 %v2560_v0, %v2561_v34 }
 0x2e8   :  { %v2564_v10 = vmax.f32 %v2562_v1, %v2563_v8 }
 0x2ea   :  { %v2566_v23 = vmax.f32 %v2564_v10, %v2565_v35 }
 0x2ec   :  { %v2592_v14 = vmax.f32 %v5003_v40, %v2566_v23  ;;  %v2785_v40 = vunpack.c.l.b16 %v2758_v26 }
 0x2ee   :  { %v2607_v47 = vrot.slane %v2592_v14, 4 }
 0x2f0   :  { %v2608_v49 = vmax.f32 %v2592_v14, %v2607_v47  ;;  %v4402_v47 = vld [vmem:[#allocation8] sm:$0xff]  }
 0x2f2   :  { %v2609_v4 = vrot.slane %v2608_v49, 2 }
 0x2f4   :  { %v2610_v19 = vmax.f32 %v2608_v49, %v2609_v4  ;;  %v5217_v49 = vld [vmem:[%s5303_s4 + $0x10] sm:$0xff]   ;;  %v5224_v4 = vld [vmem:[%s5303_s4 + $0x18] sm:$0xff]  }
 0x2f6   :  { %v2611_v30 = vrot.slane %v2610_v19, 1 }
 0x2f8   :  { %v2612_v24 = vmax.f32 %v2610_v19, %v2611_v30  ;;  %v5236_v19 = vld [vmem:[%s5303_s4 + $0x28] sm:$0xff]   ;;  %v5248_v30 = vld [vmem:[%s5303_s4 + $0x38] sm:$0xff]   ;;  %s4531_s4 = smov [#allocation10]  }
 0x2f9   :  { %s3600_s15 = sshll.u32 %s4531_s4, 4  ;;  %s3601_s15 = int_to_ptr.vmem [resolvable:$true] %s3600_s15 }
 0x2fa   :  { %v2756_v5 = vpack.c.bf16 %v2612_v24, %v2612_v24  ;;  %s4492_s16 = scalar_lea.vmem %s3601_s15, 128  ;;  %p4497_p5 = scmp.lt.s32.totalorder %s3601_s15, %s3601_s15 }
 0x2fb   :  { %p4493_p4 = scmp.ne.s32.totalorder %s3601_s15, %s4492_s16  ;;  %p4498_p6 = scmp.lt.s32.totalorder %s4492_s16, %s4492_s16 }
 0x2fc   :  { %v2783_v25 = vunpack.c.l.b16 %v2756_v5 }
 0x2fd   :  { %p4499_p7 = por %p4498_p6, %p4497_p5 }
 0x2fe   :  { %v2795_v51 = vsel %vm2794_vm9, %v2783_v25, %v2793_v41  ;;  %v4390_v41 = vld [vmem:[%s5304_s5 + $0x20] sm:$0xff]  }
 0x2ff   :  { %v2797_v9 = vsel %vm2796_vm10, %v2784_v29, %v2795_v51  ;;  %p4500_p8 = pnand %p4499_p7, %p4493_p4 }
 0x300   :  { %v2799_v17 = vsel %vm2798_vm11, %v2785_v40, %v2797_v9 }
 0x301   :  { %v2800_v39 = vpack.c.b16 %v2799_v17, %v2799_v17 }
 0x303   :  { %4236 = vmatmul.mubr.msk.bf16.vlgmr.msra.gmra.mrb[84].mxu1 %vm2198_vm2, %v2800_v39 }
 0x304   :  { %4240 = vmatpush3.bf16.msra.mxu1 %v5090_v42  ;;  %4243 = vmatprep.mubr.msk.bf16.mxu1 %vm2198_vm2, %v4386_v11  ;;  %v4389_v42 = vld [vmem:[%s5304_s5 + $0x18] sm:$0xff]  }
 0x305   :  { %4241 = vmatprep.subr.bf16.mxu1 %v4385_v53 }
 0x308   :  { %4242 = vmatpush3.bf16.msra.mxu1 %v4385_v53 }
 0x30b   :  { %4244 = vmatmul.mubr.msk.bf16.vlgmr.msra.gmra.mrb[88].mxu1 %vm2198_vm2, %v4387_v36 }
 0x30c   :  { %4247 = vmatprep.mubr.msk.bf16.mxu1 %vm2198_vm2, %v4388_v38 }
 0x313   :  { %4248 = vmatmul.mubr.msk.bf16.gmra.mrb[92].mxu1 %vm2198_vm2, %v4389_v42 }
 0x314   :  { %4251 = vmatprep.mubr.msk.bf16.mxu1 %vm2198_vm2, %v4390_v41 }
 0x31b   :  { %4252 = vmatmul.mubr.msk.bf16.gmra.mrb[96].mxu1 %vm2198_vm2, %v4391_v55 }
 0x31c   :  { %4255 = vmatprep.mubr.msk.bf16.mxu1 %vm2198_vm2, %v4392_v13 }
 0x323   :  { %4256 = vmatmul.mubr.msk.bf16.gmra.mrb[100].mxu1 %vm2198_vm2, %v4393_v16 }
 0x324   :  { %4275 = vmatprep.mubr.bf16.mxu1 %v5204_v52 }
 0x339   :  { %v4229_v46 = vpop.f32.mrb[80].mxu1 }
 0x33a   :  { %v1862_v31 = vpop.f32.mrb[81].mxu1 }
 0x33b   :  { %v4230_v48 = vpop.f32.mrb[82].mxu1 }
 0x33c   :  { %v1865_v50 = vpop.f32.mrb[83].mxu1 }
 0x3d6   :  { %v5207_v33 = vpop.f32.mrb[84].mxu1 }
 0x3d7   :  { %v4237_v27 = vpop.f32.mrb[85].mxu1 }
 0x3d8   :  { %v2853_v59 = vpop.f32.mrb[86].mxu1 }
 0x3d9   :  { %v4238_v61 = vpop.f32.mrb[87].mxu1 }
 0x3de   :  { %v4245_v44 = vpop.f32.mrb[88].mxu1 }
 0x3df   :  { %v3002_v18 = vpop.f32.mrb[89].mxu1 }
 0x3e0   :  { %v4246_v28 = vpop.f32.mrb[90].mxu1 }
 0x3e1   :  { %v3066_v43 = vpack.c.bf16 %v4246_v28, %v4245_v44  ;;  %v3005_v54 = vpop.f32.mrb[91].mxu1 }
 0x3e2   :  { %v3065_v56 = vpack.c.bf16 %v3005_v54, %v3002_v18 }
 0x3e4   :  { %4259 = vmatprep.subr.bf16.mxu1 %v3065_v56 }
 0x3e5   :  { %4260 = vmatpush3.bf16.msra.mxu1 %v3065_v56 }
 0x3e6   :  { %v4249_v58 = vpop.f32.mrb[92].mxu1  ;;  %4261 = vmatprep.subr.bf16.mxu1 %v3066_v43 }
 0x3e7   :  { %v3018_v45 = vpop.f32.mrb[93].mxu1 }
 0x3e8   :  { %v4250_v60 = vpop.f32.mrb[94].mxu1 }
 0x3e9   :  { %v3068_v62 = vpack.c.bf16 %v4250_v60, %v4249_v58  ;;  %v3021_v0 = vpop.f32.mrb[95].mxu1  ;;  %4262 = vmatpush3.bf16.msra.mxu1 %v3066_v43 }
 0x3ea   :  { %v3067_v2 = vpack.c.bf16 %v3021_v0, %v3018_v45 }
 0x3ec   :  { %4263 = vmatprep.subr.bf16.mxu1 %v3067_v2 }
 0x3ed   :  { %4264 = vmatpush3.bf16.msra.mxu1 %v3067_v2 }
 0x3ee   :  { %v4253_v63 = vpop.f32.mrb[96].mxu1  ;;  %4265 = vmatprep.subr.bf16.mxu1 %v3068_v62 }
 0x3ef   :  { %v3034_v34 = vpop.f32.mrb[97].mxu1 }
 0x3f0   :  { %v4254_v1 = vpop.f32.mrb[98].mxu1 }
 0x3f1   :  { %v3070_v6 = vpack.c.bf16 %v4254_v1, %v4253_v63  ;;  %v3037_v8 = vpop.f32.mrb[99].mxu1  ;;  %4266 = vmatpush3.bf16.msra.mxu1 %v3068_v62 }
 0x3f2   :  { %v3069_v10 = vpack.c.bf16 %v3037_v8, %v3034_v34 }
 0x3f4   :  { %4267 = vmatprep.subr.bf16.mxu1 %v3069_v10 }
 0x3f5   :  { %4268 = vmatpush3.bf16.msra.mxu1 %v3069_v10 }
 0x3f6   :  { %v4257_v21 = vpop.f32.mrb[100].mxu1  ;;  %4269 = vmatprep.subr.bf16.mxu1 %v3070_v6 }
 0x3f7   :  { %v3050_v35 = vpop.f32.mrb[101].mxu1 }
 0x3f8   :  { %v4258_v23 = vpop.f32.mrb[102].mxu1 }
 0x3f9   :  { %v3072_v12 = vpack.c.bf16 %v4258_v23, %v4257_v21  ;;  %v3053_v14 = vpop.f32.mrb[103].mxu1  ;;  %4270 = vmatpush3.bf16.msra.mxu1 %v3070_v6 }
 0x3fa   :  { %v3071_v15 = vpack.c.bf16 %v3053_v14, %v3050_v35 }
 0x3fc   :  { %4271 = vmatprep.subr.bf16.mxu1 %v3071_v15 }
 0x3fd   :  { %4272 = vmatpush3.bf16.msra.mxu1 %v3071_v15 }
 0x3fe   :  { %4273 = vmatprep.subr.bf16.mxu1 %v3072_v12 }
 0x401   :  { %4274 = vmatpush3.bf16.msra.mxu1 %v3072_v12 }
 0x402   :  { %4291 = vmatprep.subr.bf16.mxu1 %v4402_v47 }
 0x404   :  { %4276 = vmatmul.mubr.bf16.vlgmr.msra.gmra.mrb[104].mxu1 %v5212_v37 }
 0x405   :  { %4279 = vmatprep.mubr.bf16.mxu1 %v5217_v49  ;;  %4292 = vmatpush3.bf16.msra.mxu1 %v4402_v47 }
 0x406   :  { %4293 = vmatprep.subr.bf16.mxu1 %v4403_v32 }
 0x409   :  { %4294 = vmatpush3.bf16.msra.mxu1 %v4403_v32 }
 0x40c   :  { %4280 = vmatmul.mubr.bf16.gmra.mrb[108].mxu1 %v5224_v4 }
 0x40d   :  { %4283 = vmatprep.mubr.bf16.mxu1 %v5229_v7 }
 0x414   :  { %4284 = vmatmul.mubr.bf16.gmra.mrb[112].mxu1 %v5236_v19 }
 0x415   :  { %4287 = vmatprep.mubr.bf16.mxu1 %v5241_v20 }
 0x41c   :  { %4288 = vmatmul.mubr.bf16.gmra.mrb[116].mxu1 %v5248_v30 }
 0x4d7   :  { %v4277_v22 = vpop.f32.mrb[104].mxu1 }
 0x4d8   :  { %v3236_v24 = vmul.f32 0.2, %v4277_v22  ;;  %v3155_v3 = vpop.f32.mrb[105].mxu1  ;;  %vm3220_vm12 = vcmp.ge.f32.partialorder %v4277_v22, 0.0 }
 0x4d9   :  { %v3234_v5 = vmul.f32 0.2, %v3155_v3  ;;  %v4278_v26 = vpop.f32.mrb[106].mxu1  ;;  %vm3218_vm13 = vcmp.ge.f32.partialorder %v3155_v3, 0.0 }
 0x4da   :  { %vm3221_vm14 = vcmp.ge.f32.partialorder %v4278_v26, 0.0  ;;  %v3237_v25 = vmul.f32 0.2, %v4278_v26  ;;  %v3158_v29 = vpop.f32.mrb[107].mxu1  ;;  %v3252_v51 = vsel %vm3220_vm12, %v4277_v22, %v3236_v24 }
 0x4db   :  { %vm3219_vm15 = vcmp.ge.f32.partialorder %v3158_v29, 0.0  ;;  %v3235_v40 = vmul.f32 0.2, %v3158_v29  ;;  %v3250_v17 = vsel %vm3218_vm13, %v3155_v3, %v3234_v5 }
 0x4dc   :  { %v3253_v9 = vsel %vm3221_vm14, %v4278_v26, %v3237_v25 }
 0x4dd   :  { %v3267_v11 = vpack.c.bf16 %v3253_v9, %v3252_v51  ;;  %v3251_v39 = vsel %vm3219_vm15, %v3158_v29, %v3235_v40 }
 0x4de   :  { %v3266_v53 = vpack.c.bf16 %v3251_v39, %v3250_v17 }
 0x4df   :  { %v4281_v36 = vpop.f32.mrb[108].mxu1 }
 0x4e0   :  { %v3240_v38 = vmul.f32 0.2, %v4281_v36  ;;  %v3171_v42 = vpop.f32.mrb[109].mxu1  ;;  %4295 = vmatprep.mubr.msk.bf16.mxu1 %vm2198_vm2, %v3266_v53  ;;  %vm3224_vm0 = vcmp.ge.f32.partialorder %v4281_v36, 0.0 }
 0x4e1   :  { %v3238_v41 = vmul.f32 0.2, %v3171_v42  ;;  %v4282_v55 = vpop.f32.mrb[110].mxu1  ;;  %4296 = vmatmul.mubr.msk.bf16.vlgmr.msra.gmra.mrb[120].mxu1 %vm2198_vm2, %v3267_v11  ;;  %vm3222_vm1 = vcmp.ge.f32.partialorder %v3171_v42, 0.0 }
 0x4e2   :  { %vm3225_vm3 = vcmp.ge.f32.partialorder %v4282_v55, 0.0  ;;  %v3241_v13 = vmul.f32 0.2, %v4282_v55  ;;  %v3174_v16 = vpop.f32.mrb[111].mxu1  ;;  %v3256_v31 = vsel %vm3224_vm0, %v4281_v36, %v3240_v38 }
 0x4e3   :  { %vm3223_vm4 = vcmp.ge.f32.partialorder %v3174_v16, 0.0  ;;  %v3239_v46 = vmul.f32 0.2, %v3174_v16  ;;  %v3254_v50 = vsel %vm3222_vm1, %v3171_v42, %v3238_v41 }
 0x4e4   :  { %v3257_v48 = vsel %vm3225_vm3, %v4282_v55, %v3241_v13 }
 0x4e5   :  { %v3269_v27 = vpack.c.bf16 %v3257_v48, %v3256_v31  ;;  %v3255_v59 = vsel %vm3223_vm4, %v3174_v16, %v3239_v46 }
 0x4e6   :  { %v3268_v61 = vpack.c.bf16 %v3255_v59, %v3254_v50 }
 0x4e7   :  { %v4285_v44 = vpop.f32.mrb[112].mxu1 }
 0x4e8   :  { %v3244_v18 = vmul.f32 0.2, %v4285_v44  ;;  %v3187_v28 = vpop.f32.mrb[113].mxu1  ;;  %4299 = vmatprep.mubr.msk.bf16.mxu1 %vm2198_vm2, %v3268_v61  ;;  %vm3228_vm5 = vcmp.ge.f32.partialorder %v4285_v44, 0.0 }
 0x4e9   :  { %v3242_v43 = vmul.f32 0.2, %v3187_v28  ;;  %v4286_v54 = vpop.f32.mrb[114].mxu1  ;;  %4300 = vmatmul.mubr.msk.bf16.gmra.mrb[124].mxu1 %vm2198_vm2, %v3269_v27  ;;  %vm3226_vm7 = vcmp.ge.f32.partialorder %v3187_v28, 0.0 }
 0x4ea   :  { %vm3229_vm8 = vcmp.ge.f32.partialorder %v4286_v54, 0.0  ;;  %v3245_v56 = vmul.f32 0.2, %v4286_v54  ;;  %v3190_v58 = vpop.f32.mrb[115].mxu1  ;;  %v3260_v60 = vsel %vm3228_vm5, %v4285_v44, %v3244_v18 }
 0x4eb   :  { %vm3227_vm9 = vcmp.ge.f32.partialorder %v3190_v58, 0.0  ;;  %v3243_v45 = vmul.f32 0.2, %v3190_v58  ;;  %v3258_v0 = vsel %vm3226_vm7, %v3187_v28, %v3242_v43 }
 0x4ec   :  { %v3261_v62 = vsel %vm3229_vm8, %v4286_v54, %v3245_v56 }
 0x4ed   :  { %v3271_v2 = vpack.c.bf16 %v3261_v62, %v3260_v60  ;;  %v3259_v63 = vsel %vm3227_vm9, %v3190_v58, %v3243_v45 }
 0x4ee   :  { %v3270_v34 = vpack.c.bf16 %v3259_v63, %v3258_v0 }
 0x4ef   :  { %v4289_v1 = vpop.f32.mrb[116].mxu1 }
 0x4f0   :  { %v3248_v6 = vmul.f32 0.2, %v4289_v1  ;;  %v3203_v8 = vpop.f32.mrb[117].mxu1  ;;  %4303 = vmatprep.mubr.msk.bf16.mxu1 %vm2198_vm2, %v3270_v34  ;;  %vm3232_vm10 = vcmp.ge.f32.partialorder %v4289_v1, 0.0 }
 0x4f1   :  { %v3246_v10 = vmul.f32 0.2, %v3203_v8  ;;  %v4290_v21 = vpop.f32.mrb[118].mxu1  ;;  %4304 = vmatmul.mubr.msk.bf16.gmra.mrb[128].mxu1 %vm2198_vm2, %v3271_v2  ;;  %vm3230_vm11 = vcmp.ge.f32.partialorder %v3203_v8, 0.0 }
 0x4f2   :  { %vm3233_vm12 = vcmp.ge.f32.partialorder %v4290_v21, 0.0  ;;  %v3249_v35 = vmul.f32 0.2, %v4290_v21  ;;  %v3206_v23 = vpop.f32.mrb[119].mxu1  ;;  %v3264_v14 = vsel %vm3232_vm10, %v4289_v1, %v3248_v6 }
 0x4f3   :  { %vm3231_vm13 = vcmp.ge.f32.partialorder %v3206_v23, 0.0  ;;  %v3247_v12 = vmul.f32 0.2, %v3206_v23  ;;  %v3262_v47 = vsel %vm3230_vm11, %v3203_v8, %v3246_v10 }
 0x4f4   :  { %v3265_v15 = vsel %vm3233_vm12, %v4290_v21, %v3249_v35 }
 0x4f5   :  { %v3273_v32 = vpack.c.bf16 %v3265_v15, %v3264_v14  ;;  %v3263_v22 = vsel %vm3231_vm13, %v3206_v23, %v3247_v12  ;;  %v3739_v12 = vld [vmem:[#allocation5] ss:$0 sm:$0xff] }
 0x4f6   :  { %v3272_v24 = vpack.c.bf16 %v3263_v22, %v3262_v47  ;;  %v2851_v15 = vadd.f32 %v3739_v12, %v5207_v33 }
 0x4f8   :  { %4307 = vmatprep.mubr.msk.bf16.mxu1 %vm2198_vm2, %v3272_v24  ;;  %v3516_v47 = vpack.c.bf16 %v2851_v15, %v2851_v15 }
 0x4f9   :  { %4308 = vmatmul.mubr.msk.bf16.gmra.mrb[132].mxu1 %vm2198_vm2, %v3273_v32  ;;  %vm3525_vm2 = vcmask 523264  }
 0x4fa   :  { %4327 = vmatprep.mubr.bf16.mxu1 %v5204_v52 }
 0x5b4   :  { %v4297_v3 = vpop.f32.mrb[120].mxu1 }
 0x5b5   :  { %v3348_v5 = vpop.f32.mrb[121].mxu1 }
 0x5b6   :  { %v4298_v26 = vpop.f32.mrb[122].mxu1 }
 0x5b7   :  { %v3412_v25 = vpack.c.bf16 %v4298_v26, %v4297_v3  ;;  %v3351_v29 = vpop.f32.mrb[123].mxu1 }
 0x5b8   :  { %v3411_v40 = vpack.c.bf16 %v3351_v29, %v3348_v5 }
 0x5ba   :  { %4311 = vmatprep.subr.bf16.mxu1 %v3411_v40 }
 0x5bb   :  { %4312 = vmatpush3.bf16.msra.mxu1 %v3411_v40 }
 0x5bc   :  { %v4301_v51 = vpop.f32.mrb[124].mxu1  ;;  %4313 = vmatprep.subr.bf16.mxu1 %v3412_v25 }
 0x5bd   :  { %v3364_v9 = vpop.f32.mrb[125].mxu1 }
 0x5be   :  { %v4302_v17 = vpop.f32.mrb[126].mxu1 }
 0x5bf   :  { %v3414_v11 = vpack.c.bf16 %v4302_v17, %v4301_v51  ;;  %v3367_v39 = vpop.f32.mrb[127].mxu1  ;;  %4314 = vmatpush3.bf16.msra.mxu1 %v3412_v25 }
 0x5c0   :  { %v3413_v53 = vpack.c.bf16 %v3367_v39, %v3364_v9 }
 0x5c2   :  { %4315 = vmatprep.subr.bf16.mxu1 %v3413_v53 }
 0x5c3   :  { %4316 = vmatpush3.bf16.msra.mxu1 %v3413_v53 }
 0x5c4   :  { %v4305_v36 = vpop.f32.mrb[128].mxu1  ;;  %4317 = vmatprep.subr.bf16.mxu1 %v3414_v11 }
 0x5c5   :  { %v3380_v52 = vpop.f32.mrb[129].mxu1 }
 0x5c6   :  { %v4306_v38 = vpop.f32.mrb[130].mxu1 }
 0x5c7   :  { %v3416_v42 = vpack.c.bf16 %v4306_v38, %v4305_v36  ;;  %v3383_v41 = vpop.f32.mrb[131].mxu1  ;;  %4318 = vmatpush3.bf16.msra.mxu1 %v3414_v11 }
 0x5c8   :  { %v3415_v55 = vpack.c.bf16 %v3383_v41, %v3380_v52 }
 0x5ca   :  { %4319 = vmatprep.subr.bf16.mxu1 %v3415_v55 }
 0x5cb   :  { %4320 = vmatpush3.bf16.msra.mxu1 %v3415_v55 }
 0x5cc   :  { %v4309_v13 = vpop.f32.mrb[132].mxu1  ;;  %4321 = vmatprep.subr.bf16.mxu1 %v3416_v42 }
 0x5cd   :  { %v3396_v16 = vpop.f32.mrb[133].mxu1 }
 0x5ce   :  { %v4310_v46 = vpop.f32.mrb[134].mxu1 }
 0x5cf   :  { %v3418_v31 = vpack.c.bf16 %v4310_v46, %v4309_v13  ;;  %v3399_v48 = vpop.f32.mrb[135].mxu1  ;;  %4322 = vmatpush3.bf16.msra.mxu1 %v3416_v42 }
 0x5d0   :  { %v3417_v50 = vpack.c.bf16 %v3399_v48, %v3396_v16 }
 0x5d2   :  { %4323 = vmatprep.subr.bf16.mxu1 %v3417_v50 }
 0x5d3   :  { %4324 = vmatpush3.bf16.msra.mxu1 %v3417_v50 }
 0x5d4   :  { %4325 = vmatprep.subr.bf16.mxu1 %v3418_v31 }
 0x5d7   :  { %4326 = vmatpush3.bf16.msra.mxu1 %v3418_v31 }
 0x5d8   :  { %4343 = vmatprep.subr.bf16.mxu1 %v4529_v57 }
 0x5da   :  { %4328 = vmatmul.mubr.bf16.vlgmr.msra.gmra.mrb[136].mxu1 %v5212_v37 }
 0x5db   :  { %4331 = vmatprep.mubr.bf16.mxu1 %v5217_v49 }
 0x5e2   :  { %4332 = vmatmul.mubr.bf16.gmra.mrb[140].mxu1 %v5224_v4 }
 0x5e3   :  { %4335 = vmatprep.mubr.bf16.mxu1 %v5229_v7 }
 0x5ea   :  { %4336 = vmatmul.mubr.bf16.gmra.mrb[144].mxu1 %v5236_v19 }
 0x5eb   :  { %4339 = vmatprep.mubr.bf16.mxu1 %v5241_v20 }
 0x5f2   :  { %4340 = vmatmul.mubr.bf16.gmra.mrb[148].mxu1 %v5248_v30 }
 0x5f3   :  { %4359 = vmatprep.mubr.msk.bf16.mxu1 %vm4530_vm6, %v4529_v57 }
 0x6ad   :  { %v4329_v27 = vpop.f32.mrb[136].mxu1 }
 0x6ae   :  { %v3453_v59 = vpop.f32.mrb[137].mxu1 }
 0x6af   :  { %v4330_v61 = vpop.f32.mrb[138].mxu1 }
 0x6b0   :  { %v3518_v44 = vpack.c.bf16 %v4330_v61, %v4329_v27  ;;  %v3456_v37 = vpop.f32.mrb[139].mxu1 }
 0x6b1   :  { %v3517_v49 = vpack.c.bf16 %v3456_v37, %v3453_v59 }
 0x6b2   :  { %v3533_v43 = vsel %vm3525_vm2, %v3518_v44, 0 }
 0x6b3   :  { %v3530_v4 = vsel %vm3525_vm2, %v3517_v49, 0 }
 0x6b4   :  { %4344 = vmatpush3.bf16.xpose.msra.mxu1 %v3530_v4 }
 0x6b5   :  { %v4333_v7 = vpop.f32.mrb[140].mxu1  ;;  %4345 = vmatprep.subr.bf16.mxu1 %v4529_v57 }
 0x6b6   :  { %v3469_v19 = vpop.f32.mrb[141].mxu1 }
 0x6b7   :  { %v4334_v20 = vpop.f32.mrb[142].mxu1 }
 0x6b8   :  { %v3520_v18 = vpack.c.bf16 %v4334_v20, %v4333_v7  ;;  %v3472_v30 = vpop.f32.mrb[143].mxu1 }
 0x6b9   :  { %v3519_v28 = vpack.c.bf16 %v3472_v30, %v3469_v19 }
 0x6ba   :  { %v3539_v10 = vsel %vm3525_vm2, %v3520_v18, 0 }
 0x6bb   :  { %v3536_v0 = vsel %vm3525_vm2, %v3519_v28, 0 }
 0x6bc   :  { %4346 = vmatpush3.bf16.xpose.msra.mxu1 %v3533_v43 }
 0x6bd   :  { %4347 = vmatprep.subr.bf16.mxu1 %v4529_v57  ;;  %v4337_v54 = vpop.f32.mrb[144].mxu1 }
 0x6be   :  { %v3485_v56 = vpop.f32.mrb[145].mxu1 }
 0x6bf   :  { %v4338_v58 = vpop.f32.mrb[146].mxu1 }
 0x6c0   :  { %v3522_v45 = vpack.c.bf16 %v4338_v58, %v4337_v54  ;;  %v3488_v60 = vpop.f32.mrb[147].mxu1 }
 0x6c1   :  { %v3521_v62 = vpack.c.bf16 %v3488_v60, %v3485_v56 }
 0x6c2   :  { %v3545_v35 = vsel %vm3525_vm2, %v3522_v45, 0 }
 0x6c3   :  { %v3542_v21 = vsel %vm3525_vm2, %v3521_v62, 0 }
 0x6c4   :  { %4348 = vmatpush3.bf16.xpose.msra.mxu1 %v3536_v0 }
 0x6c5   :  { %4349 = vmatprep.subr.bf16.mxu1 %v4529_v57  ;;  %v4341_v2 = vpop.f32.mrb[148].mxu1 }
 0x6c6   :  { %v3501_v63 = vpop.f32.mrb[149].mxu1 }
 0x6c7   :  { %v4342_v34 = vpop.f32.mrb[150].mxu1 }
 0x6c8   :  { %v3524_v1 = vpack.c.bf16 %v4342_v34, %v4341_v2  ;;  %v3504_v6 = vpop.f32.mrb[151].mxu1 }
 0x6c9   :  { %v3523_v8 = vpack.c.bf16 %v3504_v6, %v3501_v63 }
 0x6ca   :  { %v3551_v14 = vsel %vm3525_vm2, %v3524_v1, 0 }
 0x6cb   :  { %v3548_v23 = vsel %vm3525_vm2, %v3523_v8, 0 }
 0x6cc   :  { %4350 = vmatpush3.bf16.xpose.msra.mxu1 %v3539_v10 }
 0x6cd   :  { %4351 = vmatprep.subr.bf16.mxu1 %v4529_v57 }
 0x6d4   :  { %4352 = vmatpush3.bf16.xpose.msra.mxu1 %v3542_v21 }
 0x6d5   :  { %4353 = vmatprep.subr.bf16.mxu1 %v4529_v57 }
 0x6dc   :  { %4354 = vmatpush3.bf16.xpose.msra.mxu1 %v3545_v35 }
 0x6dd   :  { %4355 = vmatprep.subr.bf16.mxu1 %v4529_v57 }
 0x6e4   :  { %4356 = vmatpush3.bf16.xpose.msra.mxu1 %v3548_v23 }
 0x6e5   :  { %4357 = vmatprep.subr.bf16.mxu1 %v4529_v57 }
 0x6ec   :  { %4358 = vmatpush3.bf16.xpose.msra.mxu1 %v3551_v14 }
 0x6f3   :  { %4360 = vmatmul.mubr.msk.bf16.vlgmr.msra.gmra.mrb[152].mxu1 %vm3525_vm2, %v3516_v47 }
 0x7c6   :  { %v3587_v32 = vpop.f32.mrb[152].mxu1 }
 0x7c7   :  { %3593 = vst [vmem:[#allocation10] sm:$0xff] %v3587_v32  ;;  %v4361_v22 = vpop.f32.mrb[153].mxu1 }
 0x7c8   :  { %v3590_v24 = vpop.f32.mrb[154].mxu1 }
 0x7c9   :  { %4503 = shalt.err (!%p4500_p8)
}
 0x7ca   :  { %s4504_s30 = scalar_lea.hbm %s5307_s8, 128 }
 0x7cb   :  { %p4505_p9 = scmp.ne.s32.totalorder %s5307_s8, %s4504_s30  ;;  %p4508_p10 = scmp.lt.u32.totalorder %s4504_s30, %s5307_s8 }
 0x7cd   :  { %p4510_p11 = pnand %p4508_p10, %p4505_p9 }
 0x7cf   :  { %4513 = shalt.err (!%p4510_p11)
}
 0x7d0   :  { %3603 = dma.vmem_to_hbm [thread:$0]  %s3601_s15, 128, %s5307_s8, [#allocation4]   ;;  %v4362_v57 = vpop.f32.mrb[155].mxu1 }
 0x7d1   :  { %4520 = dma.done.wait [#allocation4], 128  }
 0x7d2   :  { %4521 = vsyncadd [#allocation4], 4294967168 }
 0x7d3   :  { %3607 = vsyncpa [#allocation3], 1 }
 0x7d4   :  { %3608 = vsyncpa [#allocation6], 1 }
 0x7d5   :  { %3609 = vsyncpa [#allocation9], 1 }
 0x7d6   :  { %3610 = vsyncpa [#allocation4], 1 }

</bundles_post_ra>
